<compile_context>
chip_gen: v7x
topology: tpu7x:2x2x1
jax: 0.10.0
libtpu: 0.0.40
codegen_flags: <defaults>
</compile_context>

<pallas_src>
import functools

import jax
import jax.numpy as jnp
from jax.experimental import pallas as pl
from jax.experimental.pallas import tpu as pltpu


LANE = 128   # lane-dense feature / hidden width presented to the kernel
TM = 128     # dst-row tile


# ----------------------------- fused Pallas kernel ---------------------------

def _hetero_sage_layer_kernel(nvalid_ref,   # SMEM  [T]              int32 (scalar prefetch)
                              a_ref,        # VMEM  [TM, N_pad]      bf16  A[t, k] row tile
                              y_ref,        # VMEM  [N_pad, LANE]    bf16  Y[t, k] = X_src @ W_neigh
                              xd_ref,       # VMEM  [TM, LANE]       bf16  x[dst type t] row tile
                              wr_ref,       # VMEM  [LANE, LANE]     bf16  sum of W_root over edge types
                              b_ref,        # VMEM  [1, LANE]        f32   sum of biases over edge types
                              out_ref,      # VMEM  [TM, LANE]       bf16 (intermediate) / f32 (last)
                              acc_ref,      # VMEM scratch [TM, LANE] f32
                              *, do_leaky, do_skip, do_norm):
    t = pl.program_id(0)
    i = pl.program_id(1)
    k = pl.program_id(2)

    # ---- init: root path + pre-summed bias, once per (dst type, row tile) ----
    @pl.when(k == 0)
    def _():
        acc_ref[...] = (
            jnp.dot(xd_ref[...], wr_ref[...], preferred_element_type=jnp.float32)
            + b_ref[...])

    # ---- one incoming edge type per grid step: acc += A_k @ (X_src @ W_neigh_k)
    acc_ref[...] += jnp.dot(a_ref[...], y_ref[...],
                            preferred_element_type=jnp.float32)

    # ---- fused epilogue on the last edge type ---------------------------------
    @pl.when(k == pl.num_programs(2) - 1)
    def _():
        v = acc_ref[...]
        if do_leaky:                          # torch.nn.LeakyReLU default slope 0.01
            v = jnp.where(v > 0, v, 0.01 * v)
        if do_skip:                           # layer_connectivity == 'sum' (heads == 1)
            v = v + xd_ref[...].astype(jnp.float32)   # identity = layer-input x of dst type
        # mask padded dst rows so nothing leaks through the bf16 intermediate outputs
        row = i * TM + jax.lax.broadcasted_iota(jnp.int32, v.shape, 0)
        v = jnp.where(row < nvalid_ref[t], v, 0.0)
        if do_norm:                           # F.normalize(v, 2, -1), eps=1e-12
            ssq = jnp.sum(v * v, axis=-1, keepdims=True)
            v = v * jax.lax.rsqrt(jnp.maximum(ssq, 1e-24))
        out_ref[...] = v.astype(out_ref.dtype)


def hetero_sage_layer(n_valid, a_all, y_all, x_stack, wr_stack, b_stack,
                      *, do_leaky, do_skip, do_norm, out_dtype):
    """One fused call per layer: all dst node types, all incoming edge types, epilogue."""
    T, K, n_pad, _ = a_all.shape
    lane = x_stack.shape[-1]
    grid = (T, n_pad // TM, K)

    kernel = functools.partial(_hetero_sage_layer_kernel, do_leaky=do_leaky,
                               do_skip=do_skip, do_norm=do_norm)

    in_specs = [
        pl.BlockSpec((None, None, TM, n_pad),   lambda t, i, k, nv: (t, k, i, 0)),   # A[t, k]
        pl.BlockSpec((None, None, n_pad, lane), lambda t, i, k, nv: (t, k, 0, 0)),   # Y[t, k]
        pl.BlockSpec((None, TM, lane),          lambda t, i, k, nv: (t, i, 0)),      # x[dst t] tile
        pl.BlockSpec((None, lane, lane),        lambda t, i, k, nv: (t, 0, 0)),      # sum W_root[t]
        pl.BlockSpec((None, 1, lane),           lambda t, i, k, nv: (t, 0, 0)),      # sum bias[t]
    ]
    out_spec = pl.BlockSpec((None, TM, lane), lambda t, i, k, nv: (t, i, 0))

    return pl.pallas_call(
        kernel,
        out_shape=jax.ShapeDtypeStruct((T, n_pad, lane), out_dtype),
        grid_spec=pltpu.PrefetchScalarGridSpec(
            num_scalar_prefetch=1,
            grid=grid,
            in_specs=in_specs,
            out_specs=out_spec,
            scratch_shapes=[pltpu.VMEM((TM, lane), jnp.float32)],
        ),
        compiler_params=pltpu.CompilerParams(
            dimension_semantics=("parallel", "parallel", "arbitrary"),
            vmem_limit_bytes=48 * 1024 * 1024),
    )(n_valid, a_all, y_all, x_stack, wr_stack, b_stack)


# --------------------------------- forward -----------------------------------

def msg_passing_forward(x_stack, n_valid, a_all, wn_all, wr_all, b_all, src_map,
                        *, skip="sum", l2_norm=True):
    """x_stack: [T, N_pad, LANE] bf16 node features (row-/lane-padded, padded rows zero).
       n_valid: [T] int32 true node counts per type.
       a_all:   [T, K_max, N_pad, N_pad] bf16 mean-normalized adjacency per (dst type, edge).
       wn_all/wr_all/b_all: per layer -> [T,K_max,LANE,LANE] bf16 / [T,LANE,LANE] bf16 / [T,1,LANE] f32.
       src_map: static [T][K_max] src node-type index (padded slots have zero W_neigh)."""
    num_layers = len(wn_all)
    T = x_stack.shape[0]
    K = a_all.shape[1]
    for l in range(num_layers):
        is_in, is_out = (l == 0), (l == num_layers - 1)
        do_leaky = not is_out
        do_skip = (not is_out) and (not is_in) and (skip == "sum")
        # Precompute Y[t,k] = X_src(t,k) @ W_neigh[t,k] once per layer (small XLA matmuls),
        # so the hot Pallas loop streams only A and an already-bf16 Y.
        y = []
        for t in range(T):
            yk = []
            for k in range(K):
                xs = x_stack[src_map[t][k]]
                yk.append(jnp.dot(xs, wn_all[l][t, k],
                                  preferred_element_type=jnp.float32).astype(jnp.bfloat16))
            y.append(jnp.stack(yk))
        y_all = jnp.stack(y)
        out_dtype = jnp.float32 if is_out else jnp.bfloat16
        x_stack = hetero_sage_layer(
            n_valid, a_all, y_all, x_stack, wr_all[l], b_all[l],
            do_leaky=do_leaky, do_skip=do_skip, do_norm=l2_norm, out_dtype=out_dtype)
    return x_stack


# ------------------------------- JAX glue -------------------------------------

def build_norm_adj(src, dst, n_src, n_dst):
    """Dense mean-normalized adjacency: A[i, j] = (#edges j->i) / in_degree(i)."""
    counts = jnp.zeros((n_dst, n_src), jnp.float32).at[dst, src].add(1.0)
    deg = counts.sum(axis=1, keepdims=True)
    return counts / jnp.maximum(deg, 1.0)   # mean of empty neighborhood = 0 (PyG semantics)


def pad2(x, rows, cols):
    return jnp.pad(x, ((0, rows - x.shape[0]), (0, cols - x.shape[1])))


# --------------------------------- main ---------------------------------------

if __name__ == "__main__":
    key = jax.random.PRNGKey(0)
    kit = iter(jax.random.split(key, 64))

    HIDDEN = 32
    NUM_LAYERS = 3
    node_types = ("a", "b")
    N = {"a": 16, "b": 24}
    F_in = {"a": 8, "b": 16}
    edge_types = [("a", "to", "a"), ("a", "to", "b"), ("b", "to", "a")]
    n_edges = {("a", "to", "a"): 40, ("a", "to", "b"): 48, ("b", "to", "a"): 48}
    MACRO_AGGR = "sum"
    # Pre-summing W_root / biases across edge types below is ONLY valid for 'sum'.
    assert MACRO_AGGR == "sum", "packing assumes macro_aggregation='sum'"

    nt_idx = {nt: i for i, nt in enumerate(node_types)}
    T = len(node_types)
    n_pad = ((max(N.values()) + TM - 1) // TM) * TM   # common padded node count (multiple of TM)

    # node features (f32 unpadded copies kept for the reference)
    x = {nt: jax.random.normal(next(kit), (N[nt], F_in[nt]), jnp.float32)
         for nt in node_types}

    # random edge indices -> dense mean-normalized adjacency per edge type (f32)
    A = {}
    for et in edge_types:
        s, _, d = et
        src = jax.random.randint(next(kit), (n_edges[et],), 0, N[s])
        dst = jax.random.randint(next(kit), (n_edges[et],), 0, N[d])
        A[et] = build_norm_adj(src, dst, N[s], N[d])

    # raw per-layer, per-edge-type parameters (as produced by to_hetero), f32
    params_raw = []
    for l in range(NUM_LAYERS):
        lp = {}
        for et in edge_types:
            s, _, d = et
            fs = F_in[s] if l == 0 else HIDDEN
            fd = F_in[d] if l == 0 else HIDDEN
            w_n = jax.random.normal(next(kit), (fs, HIDDEN), jnp.float32) / jnp.sqrt(float(fs))
            w_r = jax.random.normal(next(kit), (fd, HIDDEN), jnp.float32) / jnp.sqrt(float(fd))
            b = jax.random.normal(next(kit), (HIDDEN,), jnp.float32) * 0.1
            lp[et] = (w_n, w_r, b)
        params_raw.append(lp)

    # ---------------- packed / padded operands for the fused kernel ------------
    in_edges = {nt: [et for et in edge_types if et[2] == nt] for nt in node_types}
    K_max = max(len(v) for v in in_edges.values())

    # node features: [T, N_pad, LANE] bf16 (zero-padded rows & lanes)
    x_stack = jnp.stack([pad2(x[nt], n_pad, LANE) for nt in node_types]).astype(jnp.bfloat16)
    n_valid = jnp.array([N[nt] for nt in node_types], jnp.int32)

    # static graph structure: stacked bf16 adjacency + src-type map (padded edge slots = zero A)
    a_list, src_map = [], []
    for nt in node_types:
        ets = in_edges[nt]
        blocks = [pad2(A[et], n_pad, n_pad) for et in ets]
        blocks += [jnp.zeros((n_pad, n_pad), jnp.float32)] * (K_max - len(ets))
        a_list.append(jnp.stack(blocks))
        src_map.append([nt_idx[et[0]] for et in ets] + [0] * (K_max - len(ets)))
    a_all = jnp.stack(a_list).astype(jnp.bfloat16)

    # packed params per layer: neighbor weights stacked per (dst type, edge slot) bf16;
    # root weights & biases pre-summed over edge types (macro_aggregation='sum')
    wn_all, wr_all, b_all = [], [], []
    for l in range(NUM_LAYERS):
        wn_t, wr_t, b_t = [], [], []
        for nt in node_types:
            ets = in_edges[nt]
            wn = [pad2(params_raw[l][et][0], LANE, LANE) for et in ets]
            wn += [jnp.zeros((LANE, LANE), jnp.float32)] * (K_max - len(ets))
            wn_t.append(jnp.stack(wn))
            wr_t.append(sum(pad2(params_raw[l][et][1], LANE, LANE) for et in ets))
            b_t.append(sum(jnp.pad(params_raw[l][et][2], (0, LANE - HIDDEN)) for et in ets
                           ).reshape(1, LANE))
        wn_all.append(jnp.stack(wn_t).astype(jnp.bfloat16))
        wr_all.append(jnp.stack(wr_t).astype(jnp.bfloat16))
        b_all.append(jnp.stack(b_t).astype(jnp.float32))

    out_stack = msg_passing_forward(x_stack, n_valid, a_all, wn_all, wr_all, b_all, src_map,
                                    skip="sum", l2_norm=True)
    out_stack = jax.block_until_ready(out_stack)

    # ---------------- pure-JAX f32 reference check ------------------------------
    def reference(x, A, params_raw):
        xs = dict(x)
        for l in range(NUM_LAYERS):
            is_in, is_out = (l == 0), (l == NUM_LAYERS - 1)
            new = {}
            for nt in node_types:
                acc = jnp.zeros((N[nt], HIDDEN), jnp.float32)
                for et in in_edges[nt]:
                    wn, wr, b = params_raw[l][et]
                    acc = acc + (A[et] @ xs[et[0]]) @ wn + xs[nt] @ wr + b
                if not is_out:
                    acc = jnp.where(acc > 0, acc, 0.01 * acc)
                    if not is_in:
                        acc = acc + xs[nt]
                nrm = jnp.sqrt(jnp.sum(acc * acc, axis=-1, keepdims=True))
                new[nt] = acc / jnp.maximum(nrm, 1e-12)
            xs = new
        return xs

    ref = reference(x, A, params_raw)
    for nt in node_types:
        got = out_stack[nt_idx[nt]][:N[nt], :HIDDEN].astype(jnp.float32)
        assert got.shape == (N[nt], HIDDEN)
        err = float(jnp.max(jnp.abs(got - jnp.asarray(ref[nt]))))
        assert err < 5e-2, f"node type {nt}: max abs err {err}"
        # padded rows / lanes must be exactly zero (epilogue mask + zero-padded weights)
        assert float(jnp.max(jnp.abs(out_stack[nt_idx[nt]][N[nt]:, :]))) == 0.0

    print("KERNEL_OK")
</pallas_src>

<mosaic_0001>
module attributes {stable_mosaic.version = 11 : i64} {
  func.func @_hetero_sage_layer_kernel(%arg0: i32, %arg1: i32, %arg2: i32, %arg3: memref<2xi32, #tpu.memory_space<smem>>, %arg4: memref<1x1x128x128xbf16, #tpu.memory_space<vmem>>, %arg5: memref<1x1x128x128xbf16, #tpu.memory_space<vmem>>, %arg6: memref<1x128x128xbf16, #tpu.memory_space<vmem>>, %arg7: memref<1x128x128xbf16, #tpu.memory_space<vmem>>, %arg8: memref<1x1x128xf32, #tpu.memory_space<vmem>>, %arg9: memref<1x128x128xbf16, #tpu.memory_space<vmem>>, %arg10: memref<128x128xf32, #tpu.memory_space<vmem>>) attributes {dimension_semantics = [#tpu.dimension_semantics<parallel>, #tpu.dimension_semantics<parallel>, #tpu.dimension_semantics<arbitrary>], iteration_bounds = array<i64: 2, 1, 2>, scalar_prefetch = 1 : i64, scratch_operands = 1 : i64, tpu.core_type = #tpu.core_type<tc>, window_params = [{transform_indices = @transform_0, window_bounds = array<i64: 1, 1, 128, 128>}, {transform_indices = @transform_1, window_bounds = array<i64: 1, 1, 128, 128>}, {transform_indices = @transform_2, window_bounds = array<i64: 1, 128, 128>}, {transform_indices = @transform_3, window_bounds = array<i64: 1, 128, 128>}, {transform_indices = @transform_4, window_bounds = array<i64: 1, 1, 128>}, {transform_indices = @transform_5, window_bounds = array<i64: 1, 128, 128>}]} {
    %c0_i32 = arith.constant 0 : i32
    %0 = arith.cmpi eq, %arg2, %c0_i32 : i32
    %1 = arith.extui %0 : i1 to i32
    %c0_i32_0 = arith.constant 0 : i32
    %2 = arith.cmpi ne, %1, %c0_i32_0 : i32
    scf.if %2 {
      %c0_13 = arith.constant 0 : index
      %c0_14 = arith.constant 0 : index
      %c0_15 = arith.constant 0 : index
      %14 = vector.load %arg6[%c0_13, %c0_14, %c0_15] : memref<1x128x128xbf16, #tpu.memory_space<vmem>>, vector<1x128x128xbf16>
      %15 = vector.shape_cast %14 : vector<1x128x128xbf16> to vector<128x128xbf16>
      %c0_16 = arith.constant 0 : index
      %c0_17 = arith.constant 0 : index
      %c0_18 = arith.constant 0 : index
      %16 = vector.load %arg7[%c0_16, %c0_17, %c0_18] : memref<1x128x128xbf16, #tpu.memory_space<vmem>>, vector<1x128x128xbf16>
      %17 = vector.shape_cast %16 : vector<1x128x128xbf16> to vector<128x128xbf16>
      %cst_19 = arith.constant dense<0.000000e+00> : vector<128x128xf32>
      %18 = tpu.matmul %15, %17, %cst_19 {dimension_numbers = #tpu.dot_dimension_numbers<[1], [0], [0], [1], [0, 0, 1, 1], [], []>} : vector<128x128xbf16>, vector<128x128xbf16>, vector<128x128xf32> -> vector<128x128xf32>
      %c0_20 = arith.constant 0 : index
      %c0_21 = arith.constant 0 : index
      %c0_22 = arith.constant 0 : index
      %19 = vector.load %arg8[%c0_20, %c0_21, %c0_22] : memref<1x1x128xf32, #tpu.memory_space<vmem>>, vector<1x1x128xf32>
      %20 = vector.shape_cast %19 : vector<1x1x128xf32> to vector<1x128xf32>
      %21 = vector.broadcast %20 : vector<1x128xf32> to vector<128x128xf32>
      %22 = arith.addf %18, %21 : vector<128x128xf32>
      %c0_23 = arith.constant 0 : index
      %c0_24 = arith.constant 0 : index
      %23 = vector.load %arg10[%c0_23, %c0_24] : memref<128x128xf32, #tpu.memory_space<vmem>>, vector<128x128xf32>
      tpu.vector_store %arg10[%c0_23, %c0_24], %22 {strides = array<i32>} : memref<128x128xf32, #tpu.memory_space<vmem>>, vector<128x128xf32>,
    } else {
    }
    %c0 = arith.constant 0 : index
    %c0_1 = arith.constant 0 : index
    %3 = vector.load %arg10[%c0, %c0_1] : memref<128x128xf32, #tpu.memory_space<vmem>>, vector<128x128xf32>
    %c0_2 = arith.constant 0 : index
    %c0_3 = arith.constant 0 : index
    %c0_4 = arith.constant 0 : index
    %c0_5 = arith.constant 0 : index
    %4 = vector.load %arg4[%c0_2, %c0_3, %c0_4, %c0_5] : memref<1x1x128x128xbf16, #tpu.memory_space<vmem>>, vector<1x1x128x128xbf16>
    %5 = vector.shape_cast %4 : vector<1x1x128x128xbf16> to vector<128x128xbf16>
    %c0_6 = arith.constant 0 : index
    %c0_7 = arith.constant 0 : index
    %c0_8 = arith.constant 0 : index
    %c0_9 = arith.constant 0 : index
    %6 = vector.load %arg5[%c0_6, %c0_7, %c0_8, %c0_9] : memref<1x1x128x128xbf16, #tpu.memory_space<vmem>>, vector<1x1x128x128xbf16>
    %7 = vector.shape_cast %6 : vector<1x1x128x128xbf16> to vector<128x128xbf16>
    %cst = arith.constant dense<0.000000e+00> : vector<128x128xf32>
    %8 = tpu.matmul %5, %7, %cst {dimension_numbers = #tpu.dot_dimension_numbers<[1], [0], [0], [1], [0, 0, 1, 1], [], []>} : vector<128x128xbf16>, vector<128x128xbf16>, vector<128x128xf32> -> vector<128x128xf32>
    %9 = arith.addf %3, %8 : vector<128x128xf32>
    %c0_10 = arith.constant 0 : index
    %c0_11 = arith.constant 0 : index
    %10 = vector.load %arg10[%c0_10, %c0_11] : memref<128x128xf32, #tpu.memory_space<vmem>>, vector<128x128xf32>
    tpu.vector_store %arg10[%c0_10, %c0_11], %9 {strides = array<i32>} : memref<128x128xf32, #tpu.memory_space<vmem>>, vector<128x128xf32>,
    %c1_i32 = arith.constant 1 : i32
    %11 = arith.cmpi eq, %arg2, %c1_i32 : i32
    %12 = arith.extui %11 : i1 to i32
    %c0_i32_12 = arith.constant 0 : i32
    %13 = arith.cmpi ne, %12, %c0_i32_12 : i32
    scf.if %13 {
      %c0_13 = arith.constant 0 : index
      %c0_14 = arith.constant 0 : index
      %14 = vector.load %arg10[%c0_13, %c0_14] : memref<128x128xf32, #tpu.memory_space<vmem>>, vector<128x128xf32>
      %cst_15 = arith.constant 0.000000e+00 : f32
      %15 = vector.broadcast %cst_15 : f32 to vector<128x128xf32>
      %16 = arith.cmpf ogt, %14, %15 : vector<128x128xf32>
      %cst_16 = arith.constant 0.00999999977 : f32
      %17 = vector.broadcast %cst_16 : f32 to vector<128x128xf32>
      %18 = arith.mulf %17, %14 : vector<128x128xf32>
      %19 = arith.select %16, %14, %18 : vector<128x128xi1>, vector<128x128xf32>
      %c128_i32 = arith.constant 128 : i32
      %20 = arith.muli %arg1, %c128_i32 : i32
      %21 = tpu.iota {dimensions = array<i32: 0>} : vector<128x128xi32>
      %22 = vector.broadcast %20 : i32 to vector<128x128xi32>
      %23 = arith.addi %22, %21 : vector<128x128xi32>
      %24 = arith.index_cast %arg0 : i32 to index
      %25 = memref.load %arg3[%24] : memref<2xi32, #tpu.memory_space<smem>>
      %26 = vector.broadcast %25 : i32 to vector<128x128xi32>
      %27 = arith.cmpi slt, %23, %26 : vector<128x128xi32>
      %cst_17 = arith.constant 0.000000e+00 : f32
      %28 = vector.broadcast %cst_17 : f32 to vector<128x128xf32>
      %29 = arith.select %27, %19, %28 : vector<128x128xi1>, vector<128x128xf32>
      %30 = arith.mulf %29, %29 : vector<128x128xf32>
      %cst_18 = arith.constant dense<0.000000e+00> : vector<128xf32>
      %31 = vector.multi_reduction <add>, %30, %cst_18 [1] : vector<128x128xf32> to vector<128xf32>
      %32 = vector.shape_cast %31 : vector<128xf32> to vector<128x1xf32>
      %cst_19 = arith.constant 1.000000e-24 : f32
      %33 = vector.broadcast %cst_19 : f32 to vector<128x1xf32>
      %34 = arith.maximumf %32, %33 : vector<128x1xf32>
      %35 = math.rsqrt %34 : vector<128x1xf32>
      %36 = vector.broadcast %35 : vector<128x1xf32> to vector<128x128xf32>
      %37 = arith.mulf %29, %36 : vector<128x128xf32>
      %38 = arith.truncf %37 : vector<128x128xf32> to vector<128x128xbf16>
      %c0_20 = arith.constant 0 : index
      %c0_21 = arith.constant 0 : index
      %c0_22 = arith.constant 0 : index
      %39 = vector.load %arg9[%c0_20, %c0_21, %c0_22] : memref<1x128x128xbf16, #tpu.memory_space<vmem>>, vector<1x128x128xbf16>
      %40 = vector.shape_cast %39 : vector<1x128x128xbf16> to vector<128x128xbf16>
      %41 = vector.shape_cast %38 : vector<128x128xbf16> to vector<1x128x128xbf16>
      tpu.vector_store %arg9[%c0_20, %c0_21, %c0_22], %41 {strides = array<i32>} : memref<1x128x128xbf16, #tpu.memory_space<vmem>>, vector<1x128x128xbf16>,
    } else {
    }
    return
  }
  func.func @transform_0(%arg0: i32, %arg1: i32, %arg2: i32, %arg3: memref<2xi32, #tpu.memory_space<smem>>) -> (i32, i32, i32, i32) {
    %c0_i32 = arith.constant 0 : i32
    %c0_i32_0 = arith.constant 0 : i32
    return %arg0, %arg2, %arg1, %c0_i32 : i32, i32, i32, i32
  }
  func.func @transform_1(%arg0: i32, %arg1: i32, %arg2: i32, %arg3: memref<2xi32, #tpu.memory_space<smem>>) -> (i32, i32, i32, i32) {
    %c0_i32 = arith.constant 0 : i32
    %c0_i32_0 = arith.constant 0 : i32
    %c0_i32_1 = arith.constant 0 : i32
    return %arg0, %arg2, %c0_i32, %c0_i32_0 : i32, i32, i32, i32
  }
  func.func @transform_2(%arg0: i32, %arg1: i32, %arg2: i32, %arg3: memref<2xi32, #tpu.memory_space<smem>>) -> (i32, i32, i32) {
    %c0_i32 = arith.constant 0 : i32
    %c0_i32_0 = arith.constant 0 : i32
    return %arg0, %arg1, %c0_i32 : i32, i32, i32
  }
  func.func @transform_3(%arg0: i32, %arg1: i32, %arg2: i32, %arg3: memref<2xi32, #tpu.memory_space<smem>>) -> (i32, i32, i32) {
    %c0_i32 = arith.constant 0 : i32
    %c0_i32_0 = arith.constant 0 : i32
    %c0_i32_1 = arith.constant 0 : i32
    return %arg0, %c0_i32, %c0_i32_0 : i32, i32, i32
  }
  func.func @transform_4(%arg0: i32, %arg1: i32, %arg2: i32, %arg3: memref<2xi32, #tpu.memory_space<smem>>) -> (i32, i32, i32) {
    %c0_i32 = arith.constant 0 : i32
    %c0_i32_0 = arith.constant 0 : i32
    %c0_i32_1 = arith.constant 0 : i32
    return %arg0, %c0_i32, %c0_i32_0 : i32, i32, i32
  }
  func.func @transform_5(%arg0: i32, %arg1: i32, %arg2: i32, %arg3: memref<2xi32, #tpu.memory_space<smem>>) -> (i32, i32, i32) {
    %c0_i32 = arith.constant 0 : i32
    %c0_i32_0 = arith.constant 0 : i32
    return %arg0, %arg1, %c0_i32 : i32, i32, i32
  }
}

</mosaic_0001>

<bundles_post_ra>
// kernel: tpu_custom_call.1
= control target key start
LH: loop header
LB: loop body
LE: loop exit
PB: predicated region body
PF: predicated region fallthrough
CT: control target
= control target key end

     0   :  { %s2842_s0 = inlined_call_operand.hbm [shape: s32[2], index: 0, kind: input, shape index: {}]   ;;  %s2843_s1 = inlined_call_operand.hbm [shape: bf16[2,2,128,128], index: 1, kind: input, shape index: {}]   ;;  %s2844_s2 = inlined_call_operand.hbm [shape: bf16[2,2,128,128], index: 2, kind: input, shape index: {}]   ;;  %s2845_s3 = inlined_call_operand.hbm [shape: bf16[2,128,128], index: 3, kind: input, shape index: {}]   ;;  %s2846_s4 = inlined_call_operand.hbm [shape: bf16[2,128,128], index: 4, kind: input, shape index: {}]   ;;  %s2847_s5 = inlined_call_operand.vmem [shape: f32[2,1,128], index: 5, kind: input, shape index: {}]   ;;  %s2848_s6 = inlined_call_operand.hbm [shape: bf16[2,128,128], index: 6, kind: output, shape index: {}]  }
   0x1   :  { %2869 = sst [smem:[#allocation27_spill]] %s2843_s1  ;;  %s1910_s23 = scalar_lea.hbm %s2842_s0, 16 }
   0x2   :  { %2870 = sst [smem:[#allocation28_spill]] %s2844_s2  ;;  %p1911_p0 = scmp.ne.s32.totalorder %s2842_s0, %s1910_s23 }
   0x3   :  { %2871 = sst [smem:[#allocation29_spill]] %s2845_s3  ;;  %p1914_p1 = scmp.lt.u32.totalorder %s1910_s23, %s2842_s0 }
   0x4   :  { %2872 = sst [smem:[#allocation30_spill]] %s2848_s6 }
   0x5   :  { %p1916_p2 = pnand %p1914_p1, %p1911_p0 }
   0x7   :  { %1919 = shalt.err (!%p1916_p2)  }
   0x8   :  { %s2178_s28 = smov [#allocation4]  }
   0x9   :  { %12 = dma.hbm_to_smem %s2842_s0, 16, %s2178_s28, [#allocation3] }
   0xa   :  { %2112 = dma.done.wait [#allocation3], 16 }
   0xb   :  { %2113 = vsyncadd [#allocation3], 4294967280 }
   0xc   :  { %14 = sfence }
   0xd   :  { %15 = vsyncpa [#allocation6], 0 }
   0xe   :  { %17 = vsyncpa [#allocation6 + $0x1], 0 }
   0xf   :  { %18 = vsyncpa [#allocation9], 0 }
  0x10   :  { %20 = vsyncpa [#allocation9 + $0x1], 0 }
  0x11   :  { %21 = vsyncpa [#allocation12], 0 }
  0x12   :  { %23 = vsyncpa [#allocation12 + $0x1], 0 }
  0x13   :  { %24 = vsyncpa [#allocation7], 0 }
  0x14   :  { %26 = vsyncpa [#allocation7 + $0x1], 0  ;;  %s2235_s7 = smov 0   ;;  %s2237_s8 = smov 0  }
  0x15   :  { %s2239_s9 = smov 0   ;;  %s2241_s10 = smov 0  }
  0x16   :  { %s2243_s0 = smov 0   ;;  %s2245_s11 = smov 0  }
  0x17   :  { %s2247_s12 = smov 0   ;;  %s2249_s13 = smov 0  }
  0x18   :  { %s2251_s14 = smov 0   ;;  %s2253_s15 = smov 0  }
  0x19   :  { %s2255_s16 = smov 0  }
  0x1a LB: > { %2873 = sst [smem:[#allocation20_spill]] %s2156_s11  ;;  %s2289_s17 = sadd.s32 4294967295, %s2176_s16   ;;  %s2176_s16 = sphi %s2255_s16, %s32_s16   ;;  %s2172_s15 = sphi %s2253_s15, %s2921_s15   ;;  %s2168_s14 = sphi %s2251_s14, %s2913_s14   ;;  %s2164_s13 = sphi %s2249_s13, %s2920_s13   ;;  %s2160_s12 = sphi %s2247_s12, %s2912_s12   ;;  %s2156_s11 = sphi %s2245_s11, %s2911_s11   ;;  %s2152_s0 = sphi %s2243_s0, %s2919_s0   ;;  %s2148_s10 = sphi %s2241_s10, %s2918_s10   ;;  %s2144_s9 = sphi %s2239_s9, %s2917_s9   ;;  %s2140_s8 = sphi %s2237_s8, %s2916_s8   ;;  %s2136_s7 = sphi %s2235_s7, %s2915_s7  }
  0x1b   : > { %2874 = sst [smem:[#allocation21_spill]] %s2168_s14  ;;  %s44_s18 = sadd.s32 1, %s2168_s14 }
  0x1c   : > { %p45_p3 = scmp.ge.s32.totalorder %s44_s18, 2  ;;  %s51_s19 = sadd.s32 1, %s2172_s15 }
  0x1d   : > { %s62_s20 = sadd.s32 1, %s2156_s11  ;;  %p69_p4 = scmp.ne.s32.totalorder %s2156_s11, %s2152_s0 }
  0x1e   : > { %s2923_s18 = smov (%p45_p3, %s44_s18), 0  ;;  %s2925_s19 = smov (!%p45_p3, %s51_s19), %s2172_s15 }
  0x1f   : > { %2875 = sst [smem:[#allocation22_spill]] %s2923_s18  ;;  %s56_s21 = ssub.s32 %s2168_s14, %s2923_s18 }
  0x20   : > { %p2857_p5 = scmp.eq.s32.totalorder %s2176_s16, 0  ;;  %p53_p6 = scmp.ge.s32.totalorder %s2925_s19, 2 }
  0x21   : > { %p75_p7 = scmp.ne.s32.totalorder %s2152_s0, %s2148_s10  ;;  %p2856_p9 = scmp.eq.s32.totalorder %s2289_s17, 0 }
  0x22   : > { %p2305_p8 = por %p2857_p5, %p69_p4  ;;  %s2927_s19 = smov (%p53_p6, %s2925_s19), 0 }
  0x23   : > { %2877 = sst [smem:[#allocation23_spill]] %s2927_s19  ;;  %p2314_p10 = por %p2856_p9, %p75_p7 }
  0x24   : > { %s2320_s24 = ssub.s32 %s2172_s15, %s2927_s19  ;;  %p2855_p11 = scmp.lt.s32.totalorder %s2176_s16, 4 }
  0x25   : > { %s2878_s23 = scalar_select %p2314_p10, 1, 0 }
  0x26   : > { %s57_s25 = sor.u32 %s56_s21, %s2320_s24  ;;  %s2849_s26 = sand.u32 1, %s2156_s11  }
  0x27   : > { %p60_p13 = scmp.eq.s32.totalorder %s57_s25, 0  ;;  %s2328_s27 = sshll.u32 %s2849_s26, 6 }
  0x28   : > { %s1455_s28 = sshll.u32 %s2168_s14, 4  ;;  %s1456_s30 = sshll.u32 %s2172_s15, 5 }
  0x29   : > { %s2332_s29 = scalar_select %p60_p13, %s2156_s11, %s62_s20  }
  0x2a   : > { %p2339_p0 = pnand %p2855_p11, %p2305_p8  ;;  %s2343_s21 = sadd.s32 %s1456_s30, %s1455_s28 }
  0x2b   : > { %2879 = sst [smem:[#allocation24_spill]] %s2332_s29  ;;  %s2853_s25 = sshll.u32 %s2343_s21, 6 }
  0x2c   : > { %s260_s26 = sand.u32 1, %s2176_s16   ;;  %s2881_s2 = sld [smem:[#allocation28_spill]] }
  0x2d   : > { %s264_s22 = scalar_lea.vmem [#allocation8], %s2328_s27  ;;  %s2358_s28 = scalar_lea.sflag [#allocation9], %s260_s26 }
  0x2e   : > { %s273_s14 = sshll.u32 %s264_s22, 4  ;;  %p1922_p3 = pneg %p2339_p0  ;;  %s2355_s14 = int_to_ptr.vmem [resolvable:$true] %s273_s14 }
  0x32   : > { %s2352_s20 = scalar_lea.hbm %s2881_s2, %s2853_s25  ;;  %s1925_s25 = scalar_lea.hbm %s2881_s2, 4096 }
  0x33   : > { %s1920_s30 = scalar_lea.hbm %s2352_s20, 1024  ;;  %p1926_p7 = scmp.lt.u32.totalorder %s2352_s20, %s2881_s2 }
  0x34   : > { %p1921_p2 = scmp.ne.s32.totalorder %s2352_s20, %s1920_s30  ;;  %p1927_p8 = scmp.lt.u32.totalorder %s1925_s25, %s1920_s30 }
  0x35   : > { %p1929_p11 = scmp.lt.u32.totalorder %s1920_s30, %s2352_s20 }
  0x36   : > { %p1923_p4 = pnand %p1922_p3, %p1921_p2  ;;  %p1928_p13 = por %p1927_p8, %p1926_p7 }
  0x38   : > { %p1924_p6 = pneg %p1923_p4  ;;  %p1930_p9 = por %p1929_p11, %p1928_p13 }
  0x3a   : > { %p1931_p5 = pnand %p1930_p9, %p1924_p6 }
  0x3c   : > { %1934 = shalt.err (!%p1931_p5)
}
  0x3d   : > { %s1935_s26 = scalar_lea.vmem %s2355_s14, 1024  ;;  %s2179_s22 = smov [#allocation8]  }
  0x3e   : > { %p1936_p2 = scmp.ne.s32.totalorder %s2355_s14, %s1935_s26  ;;  %s1940_s18 = sshll.u32 %s2179_s22, 4  ;;  %s1941_s18 = int_to_ptr.vmem [resolvable:$false] %s1940_s18 }
  0x3f   : > { %s1942_s6 = scalar_lea.vmem %s1941_s18, 2048  ;;  %p1943_p1 = scmp.lt.s32.totalorder %s2355_s14, %s1941_s18 }
  0x40   : > { %p1938_p4 = pnand %p1936_p2, %p1922_p3  ;;  %p1944_p7 = scmp.lt.s32.totalorder %s1942_s6, %s1935_s26 }
  0x42   : > { %p1939_p12 = pneg %p1938_p4  ;;  %p1945_p8 = por %p1944_p7, %p1943_p1 }
  0x44   : > { %p1946_p11 = pnand %p1945_p8, %p1939_p12 }
  0x46   : > { %1949 = shalt.err (!%p1946_p11)
}
  0x47   : > { %s2858_s29 = smov 64   ;;  %s2860_s25 = smov 4  }
  0x48   : > { %1740 = dma.hbm_to_vmem [thread:$0]  (!%p2339_p0), %s2352_s20, 1024, %s2355_s14, %s2358_s28, %s2858_s29, %s2858_s29, %s2860_s25  }
  0x49   : > { %p331_p5 = scmp.lt.s32.totalorder %s2176_s16, 5  ;;  %p2882_p9 = scmp.ge.s32.totalorder %s2176_s16, 1 }
  0x4a   : > { %s2884_s19 = sshll.u32 %s2343_s21, 6  ;;  %s2885_s1 = sld [smem:[#allocation27_spill]] }
  0x4b   : > { %p2392_p12 = pnand %p2882_p9, %p331_p5  ;;  %s239_s6 = scalar_lea.vmem [#allocation5], %s2328_s27 }
  0x4c   : > { %s250_s2 = sshll.u32 %s239_s6, 4  ;;  %s2886_s14 = sand.u32 1, %s2156_s11   ;;  %s2404_s2 = int_to_ptr.vmem [resolvable:$true] %s250_s2 }
  0x4d   : > { %s2408_s20 = scalar_lea.sflag [#allocation6], %s2886_s14 }
  0x50   : > { %s2401_s18 = scalar_lea.hbm %s2885_s1, %s2884_s19  ;;  %s1955_s26 = scalar_lea.hbm %s2885_s1, 4096 }
  0x51   : > { %s1950_s29 = scalar_lea.hbm %s2401_s18, 1024  ;;  %p1956_p2 = scmp.lt.u32.totalorder %s2401_s18, %s2885_s1 }
  0x52   : > { %p1951_p1 = scmp.ne.s32.totalorder %s2401_s18, %s1950_s29  ;;  %p1957_p4 = scmp.lt.u32.totalorder %s1955_s26, %s1950_s29 }
  0x53   : > { %p1959_p8 = scmp.lt.u32.totalorder %s1950_s29, %s2401_s18 }
  0x54   : > { %p1953_p6 = pnand %p1951_p1, %p1922_p3  ;;  %p1958_p7 = por %p1957_p4, %p1956_p2 }
  0x56   : > { %p1954_p13 = pneg %p1953_p6  ;;  %p1960_p11 = por %p1959_p8, %p1958_p7 }
  0x58   : > { %p1961_p5 = pnand %p1960_p11, %p1954_p13 }
  0x5a   : > { %1964 = shalt.err (!%p1961_p5)
}
  0x5b   : > { %s1965_s27 = scalar_lea.vmem %s2404_s2, 1024  ;;  %s2182_s6 = smov [#allocation5]  }
  0x5c   : > { %p1966_p9 = scmp.ne.s32.totalorder %s2404_s2, %s1965_s27  ;;  %s1970_s14 = sshll.u32 %s2182_s6, 4  ;;  %s1971_s14 = int_to_ptr.vmem [resolvable:$false] %s1970_s14 }
  0x5d   : > { %s1972_s25 = scalar_lea.vmem %s1971_s14, 2048  ;;  %p1973_p10 = scmp.lt.s32.totalorder %s2404_s2, %s1971_s14 }
  0x5e   : > { %p1968_p1 = pnand %p1966_p9, %p1922_p3  ;;  %p1974_p2 = scmp.lt.s32.totalorder %s1972_s25, %s1965_s27 }
  0x60   : > { %p1969_p6 = pneg %p1968_p1  ;;  %p1975_p4 = por %p1974_p2, %p1973_p10 }
  0x62   : > { %p1976_p7 = pnand %p1975_p4, %p1969_p6 }
  0x64   : > { %1979 = shalt.err (!%p1976_p7)
}
  0x65   : > { %s2887_s29 = smov 4   ;;  %s2888_s21 = smov 64  }
  0x66   : > { %1737 = dma.hbm_to_vmem [thread:$0]  (!%p2339_p0), %s2401_s18, 1024, %s2404_s2, %s2408_s20, %s2888_s21, %s2888_s21, %s2887_s29  }
  0x67   : > { %s1451_s10 = sadd.s32 4294967294, %s2176_s16   ;;  %s118_s19 = sadd.s32 1, %s2144_s9 }
  0x68   : > { %p125_p10 = scmp.ne.s32.totalorder %s2144_s9, %s2140_s8  ;;  %p2889_p3 = scmp.eq.s32.totalorder %s2320_s24, 0 }
  0x69   : > { %p2891_p13 = scmp.eq.s32.totalorder %s2176_s16, 0  ;;  %p131_p11 = scmp.ne.s32.totalorder %s2140_s8, %s2136_s7 }
  0x6a   : > { %s2444_s26 = scalar_select %p2889_p3, %s2144_s9, %s118_s19  }
  0x6b   : > { %p2448_p8 = por %p125_p10, %p2891_p13  ;;  %p209_p5 = scmp.eq.s32.totalorder %s2289_s17, 3 }
  0x6c   : > { %2890 = sst [smem:[#allocation25_spill]] %s2444_s26  ;;  %p215_p9 = scmp.eq.s32.totalorder %s1451_s10, 3 }
  0x6d   : > { %p2893_p1 = scmp.eq.s32.totalorder %s2289_s17, 0  ;;  %s2864_s2 = sand.u32 1, %s2144_s9  }
  0x6e   : > { %p2462_p0 = por %p209_p5, %p125_p10  ;;  %p2466_p2 = por %p215_p9, %p131_p11 }
  0x6f   : > { %p2457_p6 = por %p131_p11, %p2893_p1  ;;  %s2472_s20 = sshll.u32 %s2864_s2, 6 }
  0x70   : > { %s2895_s18 = scalar_select %p2462_p0, 1, 0 }
  0x71   : > { %s2894_s27 = scalar_select %p2457_p6, 1, 0 }
  0x72   : > { %s2896_s24 = scalar_select %p2466_p2, 1, 0 }
  0x73   : > { %s2865_s6 = sshll.u32 %s2172_s15, 10  ;;  %s2898_s3 = sld [smem:[#allocation29_spill]] }
  0x74   : > { %2897 = sst [smem:[#allocation26_spill]] %s2896_s24  ;;  %s287_s19 = scalar_lea.vmem [#allocation10], %s2472_s20 }
  0x75   : > { %s296_s1 = sshll.u32 %s287_s19, 4  ;;  %p2899_p4 = scmp.lt.s32.totalorder %s2176_s16, 4  ;;  %s2491_s1 = int_to_ptr.vmem [resolvable:$true] %s296_s1 }
  0x77   : > { %p2487_p7 = pnand %p2899_p4, %p2448_p8 }
  0x79   : > { %s2480_s10 = scalar_lea.hbm %s2898_s3, %s2865_s6  ;;  %p1982_p3 = pneg %p2487_p7 }
  0x7a   : > { %s1980_s2 = scalar_lea.hbm %s2480_s10, 1024  ;;  %s1985_s22 = scalar_lea.hbm %s2898_s3, 2048 }
  0x7b   : > { %p1981_p10 = scmp.ne.s32.totalorder %s2480_s10, %s1980_s2  ;;  %p1986_p8 = scmp.lt.u32.totalorder %s2480_s10, %s2898_s3 }
  0x7c   : > { %p1987_p5 = scmp.lt.u32.totalorder %s1985_s22, %s1980_s2  ;;  %p1989_p1 = scmp.lt.u32.totalorder %s1980_s2, %s2480_s10 }
  0x7d   : > { %p1983_p13 = pnand %p1982_p3, %p1981_p10 }
  0x7e   : > { %p1988_p9 = por %p1987_p5, %p1986_p8 }
  0x7f   : > { %p1984_p11 = pneg %p1983_p13 }
  0x80   : > { %p1990_p4 = por %p1989_p1, %p1988_p9 }
  0x82   : > { %p1991_p2 = pnand %p1990_p4, %p1984_p11 }
  0x84   : > { %1994 = shalt.err (!%p1991_p2)
}
  0x85   : > { %s1995_s26 = scalar_lea.vmem %s2491_s1, 1024  ;;  %s2183_s14 = smov [#allocation10]  }
  0x86   : > { %p1996_p10 = scmp.ne.s32.totalorder %s2491_s1, %s1995_s26  ;;  %s2000_s25 = sshll.u32 %s2183_s14, 4  ;;  %s2001_s25 = int_to_ptr.vmem [resolvable:$false] %s2000_s25 }
  0x87   : > { %s2002_s6 = scalar_lea.vmem %s2001_s25, 2048  ;;  %p2003_p6 = scmp.lt.s32.totalorder %s2491_s1, %s2001_s25 }
  0x88   : > { %p1998_p13 = pnand %p1996_p10, %p1982_p3  ;;  %p2004_p8 = scmp.lt.s32.totalorder %s2002_s6, %s1995_s26 }
  0x8a   : > { %p1999_p0 = pneg %p1998_p13  ;;  %p2005_p5 = por %p2004_p8, %p2003_p6 }
  0x8c   : > { %p2006_p9 = pnand %p2005_p5, %p1999_p0 }
  0x8e   : > { %2009 = shalt.err (!%p2006_p9)
}
  0x8f   : > { %1743 = dma.hbm_to_vmem [thread:$0]  (!%p2487_p7), %s2480_s10, 1024, %s2491_s1, %s2358_s28, %s2888_s21, %s2888_s21, %s2887_s29  }
  0x90   : > { %s2901_s2 = sshll.u32 %s2172_s15, 10  ;;  %s310_s14 = scalar_lea.vmem [#allocation11], %s2472_s20 }
  0x91   : > { %s2527_s26 = scalar_lea.hbm %s2846_s4, %s2901_s2  ;;  %s317_s25 = sshll.u32 %s310_s14, 4  ;;  %s2530_s25 = int_to_ptr.vmem [resolvable:$true] %s317_s25 }
  0x92   : > { %s2902_s6 = sand.u32 1, %s2144_s9   ;;  %s2010_s24 = scalar_lea.hbm %s2527_s26, 1024 }
  0x93   : > { %s2534_s3 = scalar_lea.sflag [#allocation12], %s2902_s6  ;;  %p2011_p6 = scmp.ne.s32.totalorder %s2527_s26, %s2010_s24 }
  0x94   : > { %s2015_s10 = scalar_lea.hbm %s2846_s4, 2048  ;;  %p2016_p11 = scmp.lt.u32.totalorder %s2527_s26, %s2846_s4 }
  0x95   : > { %p2013_p0 = pnand %p2011_p6, %p1982_p3  ;;  %p2017_p1 = scmp.lt.u32.totalorder %s2015_s10, %s2010_s24 }
  0x96   : > { %p2019_p10 = scmp.lt.u32.totalorder %s2010_s24, %s2527_s26 }
  0x97   : > { %p2014_p2 = pneg %p2013_p0  ;;  %p2018_p4 = por %p2017_p1, %p2016_p11 }
  0x99   : > { %p2020_p13 = por %p2019_p10, %p2018_p4 }
  0x9b   : > { %p2021_p8 = pnand %p2020_p13, %p2014_p2 }
  0x9d   : > { %2024 = shalt.err (!%p2021_p8)
}
  0x9e   : > { %s2025_s20 = scalar_lea.vmem %s2530_s25, 1024  ;;  %s2184_s19 = smov [#allocation11]  }
  0x9f   : > { %p2026_p5 = scmp.ne.s32.totalorder %s2530_s25, %s2025_s20  ;;  %s2030_s14 = sshll.u32 %s2184_s19, 4  ;;  %s2031_s14 = int_to_ptr.vmem [resolvable:$false] %s2030_s14 }
  0xa0   : > { %s2032_s6 = scalar_lea.vmem %s2031_s14, 2048  ;;  %p2033_p0 = scmp.lt.s32.totalorder %s2530_s25, %s2031_s14 }
  0xa1   : > { %p2028_p9 = pnand %p2026_p5, %p1982_p3  ;;  %p2034_p11 = scmp.lt.s32.totalorder %s2032_s6, %s2025_s20 }
  0xa3   : > { %p2029_p6 = pneg %p2028_p9  ;;  %p2035_p1 = por %p2034_p11, %p2033_p0 }
  0xa5   : > { %p2036_p4 = pnand %p2035_p1, %p2029_p6 }
  0xa7   : > { %2039 = shalt.err (!%p2036_p4)
}
  0xa8   : > { %1746 = dma.hbm_to_vmem [thread:$0]  (!%p2487_p7), %s2527_s26, 1024, %s2530_s25, %s2534_s3, %s2888_s21, %s2888_s21, %s2887_s29  }
  0xa9   : > { %335 = sbr.rel (%p2392_p12) target bundleno = 928 (0x3a0), region = 40  ;;  %s337_s24 = sand.u32 (!%p2392_p12), 1, %s2152_s0  }
  0xaa   : > { %s1469_s1 = sshll.u32 (!%p2392_p12), %s337_s24, 6  ;;  %s338_s28 = scalar_lea.sflag (!%p2392_p12), [#allocation6], %s337_s24 }
  0xab   : > { %s2566_s10 = scalar_lea.vmem (!%p2392_p12), [#allocation5], %s1469_s1  ;;  %p2903_p3 = scmp.ne.s32.totalorder (!%p2392_p12), %s2878_s23, 0 }
  0xb0   : > { %2115 = dma.done.wait (%p2903_p3), %s338_s28, 1024  }
  0xb1   : > { %2117 = vsyncadd (%p2903_p3), %s338_s28, 4294966272  ;;  %s346_s11 = sand.u32 1, %s2289_s17   ;;  %s2573_s3 = scalar_lea.vmem [#allocation8], %s1469_s1 }
  0xb2   : > { %s347_s2 = scalar_lea.sflag [#allocation9], %s346_s11 }
  0xb3   : > { %2119 = dma.done.wait (%p2903_p3), %s347_s2, 1024  }
  0xb4   : > { %2121 = vsyncadd (%p2903_p3), %s347_s2, 4294966272  ;;  %s2580_s30 = sand.u32 1, %s2140_s8   ;;  %p2904_p12 = scmp.ne.s32.totalorder %s2894_s27, 0 }
  0xb5   : > { %s1471_s29 = sshll.u32 %s2580_s30, 6 }
  0xb6   : > { %s2583_s21 = scalar_lea.vmem [#allocation10], %s1471_s29 }
  0xb7   : > { %2123 = dma.done.wait (%p2904_p12), %s347_s2, 1024  }
  0xb8   : > { %2125 = vsyncadd (%p2904_p12), %s347_s2, 4294966272  ;;  %s365_s17 = scalar_lea.sflag [#allocation12], %s2580_s30  ;;  %s2590_s26 = scalar_lea.vmem [#allocation11], %s1471_s29 }
  0xb9   : > { %2127 = dma.done.wait (%p2904_p12), %s365_s17, 1024  }
  0xba   : > { %2129 = vsyncadd (%p2904_p12), %s365_s17, 4294966272  ;;  %p415_p7 = scmp.lt.s32.totalorder %s2164_s13, 1  ;;  %s2604_s19 = scalar_lea.vmem [#allocation13], %s1471_s29 }
  0xbb   : > { %p1474_p2 = scmp.ne.s32.totalorder %s2160_s12, 0 }
  0xbc   : > { %s2598_s23 = scalar_select %p415_p7, %s2164_s13, 1 }
  0xbd   : > { %423 = sbr.rel (%p1474_p2) target bundleno = 448 (0x1c0), region = 60  ;;  %v1846_v0 = vld [vmem:[%s2590_s26] sm:$0xff] (!%p1474_p2)   ;;  %v1847_v1 = vld [vmem:[%s2590_s26 + $0x8] sm:$0xff] (!%p1474_p2)   ;;  %v1848_v2 = vld [vmem:[%s2590_s26 + $0x10] sm:$0xff] (!%p1474_p2)  }
  0xbe   : > { %s417_s20 = scalar_lea.vmem %s2847_s5, %s2598_s23  ;;  %1628 = vmatprep.subr.bf16.mxu0 (!%p1474_p2), %v1846_v0  ;;  %1692 = vmatprep.subr.bf16.mxu1 (!%p1474_p2), %v1846_v0  ;;  %v1849_v3 = vld [vmem:[%s2590_s26 + $0x18] sm:$0xff] (!%p1474_p2)   ;;  %v1854_v4 = vld [vmem:[%s2583_s21] sm:$0xff] (!%p1474_p2)   ;;  %v1851_v7 = vld [vmem:[%s2590_s26 + $0x28] sm:$0xff] (!%p1474_p2)  }
  0xbf   : > { %1629 = vmatpush3.bf16.msra.mxu0 (!%p1474_p2), %v1846_v0  ;;  %1700 = vmatpush3.bf16.msra.mxu1 (!%p1474_p2), %v1846_v0  ;;  %v1855_v5 = vld [vmem:[%s2583_s21 + $0x20] sm:$0xff] (!%p1474_p2)   ;;  %v1852_v8 = vld [vmem:[%s2590_s26 + $0x30] sm:$0xff] (!%p1474_p2)   ;;  %v1853_v9 = vld [vmem:[%s2590_s26 + $0x38] sm:$0xff] (!%p1474_p2)  }
  0xc0   : > { %1630 = vmatprep.subr.bf16.mxu0 (!%p1474_p2), %v1847_v1  ;;  %1693 = vmatprep.subr.bf16.mxu1 (!%p1474_p2), %v1847_v1  ;;  %v1850_v6 = vld [vmem:[%s2590_s26 + $0x20] sm:$0xff] (!%p1474_p2)   ;;  %v1856_v10 = vld [vmem:[%s2583_s21 + $0x8] sm:$0xff] (!%p1474_p2)   ;;  %v1858_v12 = vld [vmem:[%s2583_s21 + $0x10] sm:$0xff] (!%p1474_p2)  }
  0xc1   : > { %1644 = vmatprep.mubr.bf16.mxu0 (!%p1474_p2), %v1854_v4  ;;  %1652 = vmatprep.mubr.bf16.mxu1 (!%p1474_p2), %v1855_v5  ;;  %v1857_v11 = vld [vmem:[%s2583_s21 + $0x28] sm:$0xff] (!%p1474_p2)   ;;  %v1859_v13 = vld [vmem:[%s2583_s21 + $0x30] sm:$0xff] (!%p1474_p2)   ;;  %v1860_v14 = vld [vmem:[%s2583_s21 + $0x18] sm:$0xff] (!%p1474_p2)  }
  0xc2   : > { %v1861_v15 = vld [vmem:[%s2583_s21 + $0x38] sm:$0xff] (!%p1474_p2)  }
  0xc3   : > { %1631 = vmatpush3.bf16.msra.mxu0 (!%p1474_p2), %v1847_v1  ;;  %1701 = vmatpush3.bf16.msra.mxu1 (!%p1474_p2), %v1847_v1  ;;  %v1475_v16 = vld [vmem:[%s417_s20] ss:$0 sm:$0xff] (!%p1474_p2) }
  0xc4   : > { %1632 = vmatprep.subr.bf16.mxu0 %v1848_v2  ;;  %1694 = vmatprep.subr.bf16.mxu1 %v1848_v2 }
  0xc7   : > { %1633 = vmatpush3.bf16.msra.mxu0 %v1848_v2  ;;  %1702 = vmatpush3.bf16.msra.mxu1 %v1848_v2 }
  0xc8   : > { %1634 = vmatprep.subr.bf16.mxu0 %v1849_v3  ;;  %1695 = vmatprep.subr.bf16.mxu1 %v1849_v3 }
  0xcb   : > { %1635 = vmatpush3.bf16.msra.mxu0 %v1849_v3  ;;  %1703 = vmatpush3.bf16.msra.mxu1 %v1849_v3 }
  0xcc   : > { %1636 = vmatprep.subr.bf16.mxu0 %v1850_v6  ;;  %1696 = vmatprep.subr.bf16.mxu1 %v1850_v6 }
  0xcf   : > { %1637 = vmatpush3.bf16.msra.mxu0 %v1850_v6  ;;  %1704 = vmatpush3.bf16.msra.mxu1 %v1850_v6 }
  0xd0   : > { %1638 = vmatprep.subr.bf16.mxu0 %v1851_v7  ;;  %1697 = vmatprep.subr.bf16.mxu1 %v1851_v7 }
  0xd3   : > { %1639 = vmatpush3.bf16.msra.mxu0 %v1851_v7  ;;  %1705 = vmatpush3.bf16.msra.mxu1 %v1851_v7 }
  0xd4   : > { %1640 = vmatprep.subr.bf16.mxu0 %v1852_v8  ;;  %1698 = vmatprep.subr.bf16.mxu1 %v1852_v8 }
  0xd7   : > { %1641 = vmatpush3.bf16.msra.mxu0 %v1852_v8  ;;  %1706 = vmatpush3.bf16.msra.mxu1 %v1852_v8 }
  0xd8   : > { %1642 = vmatprep.subr.bf16.mxu0 %v1853_v9  ;;  %1699 = vmatprep.subr.bf16.mxu1 %v1853_v9 }
  0xdb   : > { %1643 = vmatpush3.bf16.msra.mxu0 %v1853_v9  ;;  %1707 = vmatpush3.bf16.msra.mxu1 %v1853_v9 }
  0xde   : > { %1645 = vmatmul.mubr.bf16.vlgmr.msra.gmra.mrb[0].mxu0 %v1856_v10  ;;  %1653 = vmatmul.mubr.bf16.vlgmr.msra.gmra.mrb[0].mxu1 %v1857_v11 }
  0xdf   : > { %1648 = vmatprep.mubr.bf16.mxu0 %v1858_v12  ;;  %1656 = vmatprep.mubr.bf16.mxu1 %v1859_v13 }
  0xe6   : > { %1649 = vmatmul.mubr.bf16.gmra.mrb[4].mxu0 %v1860_v14  ;;  %1657 = vmatmul.mubr.bf16.gmra.mrb[4].mxu1 %v1861_v15 }
 0x1b1   : > { %v1646_v17 = vpop.f32.mrb[0].mxu0  ;;  %v1654_v18 = vpop.f32.mrb[0].mxu1 }
 0x1b2   : > { %v602_v19 = vadd.f32 %v1646_v17, %v1475_v16  ;;  %v634_v20 = vadd.f32 %v1654_v18, %v1475_v16  ;;  %v593_v21 = vpop.f32.mrb[1].mxu0  ;;  %v625_v22 = vpop.f32.mrb[1].mxu1 }
 0x1b3   : > { %v594_v23 = vadd.f32 %v1475_v16, %v593_v21  ;;  %v626_v24 = vadd.f32 %v1475_v16, %v625_v22  ;;  %v1647_v25 = vpop.f32.mrb[2].mxu0  ;;  %v1655_v26 = vpop.f32.mrb[2].mxu1 }
 0x1b4   : > { %658 = vst [vmem:[#allocation2 + $0x10] sm:$0xff] %v602_v19  ;;  %666 = vst [vmem:[#allocation2 + $0x50] sm:$0xff] %v634_v20  ;;  %v605_v27 = vadd.f32 %v1647_v25, %v1475_v16  ;;  %v637_v28 = vadd.f32 %v1655_v26, %v1475_v16  ;;  %v596_v29 = vpop.f32.mrb[3].mxu0  ;;  %v628_v30 = vpop.f32.mrb[3].mxu1 }
 0x1b5   : > { %656 = vst [vmem:[#allocation2] sm:$0xff] %v594_v23  ;;  %664 = vst [vmem:[#allocation2 + $0x40] sm:$0xff] %v626_v24  ;;  %v597_v31 = vadd.f32 %v1475_v16, %v596_v29  ;;  %v629_v32 = vadd.f32 %v1475_v16, %v628_v30 }
 0x1b6   : > { %659 = vst [vmem:[#allocation2 + $0x18] sm:$0xff] %v605_v27  ;;  %667 = vst [vmem:[#allocation2 + $0x58] sm:$0xff] %v637_v28 }
 0x1b7   : > { %657 = vst [vmem:[#allocation2 + $0x8] sm:$0xff] %v597_v31  ;;  %665 = vst [vmem:[#allocation2 + $0x48] sm:$0xff] %v629_v32 }
 0x1b9   : > { %v1650_v33 = vpop.f32.mrb[4].mxu0  ;;  %v1658_v34 = vpop.f32.mrb[4].mxu1 }
 0x1ba   : > { %v618_v35 = vadd.f32 %v1650_v33, %v1475_v16  ;;  %v650_v36 = vadd.f32 %v1658_v34, %v1475_v16  ;;  %v609_v37 = vpop.f32.mrb[5].mxu0  ;;  %v641_v38 = vpop.f32.mrb[5].mxu1 }
 0x1bb   : > { %v610_v39 = vadd.f32 %v1475_v16, %v609_v37  ;;  %v642_v40 = vadd.f32 %v1475_v16, %v641_v38  ;;  %v1651_v41 = vpop.f32.mrb[6].mxu0  ;;  %v1659_v42 = vpop.f32.mrb[6].mxu1 }
 0x1bc   : > { %662 = vst [vmem:[#allocation2 + $0x30] sm:$0xff] %v618_v35  ;;  %670 = vst [vmem:[#allocation2 + $0x70] sm:$0xff] %v650_v36  ;;  %v621_v43 = vadd.f32 %v1651_v41, %v1475_v16  ;;  %v653_v44 = vadd.f32 %v1659_v42, %v1475_v16  ;;  %v612_v45 = vpop.f32.mrb[7].mxu0  ;;  %v644_v46 = vpop.f32.mrb[7].mxu1 }
 0x1bd   : > { %660 = vst [vmem:[#allocation2 + $0x20] sm:$0xff] %v610_v39  ;;  %668 = vst [vmem:[#allocation2 + $0x60] sm:$0xff] %v642_v40  ;;  %v613_v47 = vadd.f32 %v1475_v16, %v612_v45  ;;  %v645_v48 = vadd.f32 %v1475_v16, %v644_v46 }
 0x1be   : > { %663 = vst [vmem:[#allocation2 + $0x38] sm:$0xff] %v621_v43  ;;  %671 = vst [vmem:[#allocation2 + $0x78] sm:$0xff] %v653_v44 }
 0x1bf   : > { %661 = vst [vmem:[#allocation2 + $0x28] sm:$0xff] %v613_v47  ;;  %669 = vst [vmem:[#allocation2 + $0x68] sm:$0xff] %v645_v48 }
 0x1c0 PF: > { %v1862_v49 = vld [vmem:[%s2573_s3] sm:$0xff]   ;;  %v1863_v50 = vld [vmem:[%s2573_s3 + $0x8] sm:$0xff]   ;;  %v1864_v51 = vld [vmem:[%s2573_s3 + $0x10] sm:$0xff]   ;;  %p1508_p10 = scmp.ne.s32.totalorder %s2160_s12, 1 }
 0x1c1   : > { %1660 = vmatprep.subr.bf16.mxu0 %v1862_v49  ;;  %1708 = vmatprep.subr.bf16.mxu1 %v1862_v49  ;;  %v1865_v52 = vld [vmem:[%s2573_s3 + $0x18] sm:$0xff]   ;;  %v1870_v53 = vld [vmem:[%s2566_s10] sm:$0xff]   ;;  %v1867_v56 = vld [vmem:[%s2573_s3 + $0x28] sm:$0xff]   ;;  %s1048_s6 = sld [smem:[#allocation4 + %s2164_s13]] (!%p1508_p10) }
 0x1c2   : > { %1661 = vmatpush3.bf16.msra.mxu0 %v1862_v49  ;;  %1716 = vmatpush3.bf16.msra.mxu1 %v1862_v49  ;;  %v1871_v54 = vld [vmem:[%s2566_s10 + $0x20] sm:$0xff]   ;;  %v1868_v57 = vld [vmem:[%s2573_s3 + $0x30] sm:$0xff]   ;;  %v1869_v58 = vld [vmem:[%s2573_s3 + $0x38] sm:$0xff]  }
 0x1c3   : > { %1662 = vmatprep.subr.bf16.mxu0 %v1863_v50  ;;  %1709 = vmatprep.subr.bf16.mxu1 %v1863_v50  ;;  %v1866_v55 = vld [vmem:[%s2573_s3 + $0x20] sm:$0xff]   ;;  %v1872_v59 = vld [vmem:[%s2566_s10 + $0x8] sm:$0xff]   ;;  %v1874_v61 = vld [vmem:[%s2566_s10 + $0x10] sm:$0xff]  }
 0x1c4   : > { %1676 = vmatprep.mubr.bf16.mxu0 %v1870_v53  ;;  %1684 = vmatprep.mubr.bf16.mxu1 %v1871_v54  ;;  %v1873_v60 = vld [vmem:[%s2566_s10 + $0x28] sm:$0xff]   ;;  %v1875_v62 = vld [vmem:[%s2566_s10 + $0x30] sm:$0xff]   ;;  %v1876_v63 = vld [vmem:[%s2566_s10 + $0x18] sm:$0xff]  }
 0x1c5   : > { %v1877_v0 = vld [vmem:[%s2566_s10 + $0x38] sm:$0xff]   ;;  %v674_v1 = vld [vmem:[#allocation2 + $0x10] sm:$0xff]  ;;  %v672_v3 = vld [vmem:[#allocation2] sm:$0xff] }
 0x1c6   : > { %1663 = vmatpush3.bf16.msra.mxu0 %v1863_v50  ;;  %1717 = vmatpush3.bf16.msra.mxu1 %v1863_v50  ;;  %v682_v2 = vld [vmem:[#allocation2 + $0x50] sm:$0xff]  ;;  %v680_v4 = vld [vmem:[#allocation2 + $0x40] sm:$0xff]  ;;  %v675_v7 = vld [vmem:[#allocation2 + $0x18] sm:$0xff]  ;;  %v1014_v50 = vlaneseq (!%p1508_p10) }
 0x1c7   : > { %1664 = vmatprep.subr.bf16.mxu0 %v1864_v51  ;;  %1710 = vmatprep.subr.bf16.mxu1 %v1864_v51  ;;  %v683_v8 = vld [vmem:[#allocation2 + $0x58] sm:$0xff]  ;;  %v673_v13 = vld [vmem:[#allocation2 + $0x8] sm:$0xff]  ;;  %v678_v25 = vld [vmem:[#allocation2 + $0x30] sm:$0xff] }
 0x1c8   : > { %v681_v14 = vld [vmem:[#allocation2 + $0x48] sm:$0xff]  ;;  %v686_v26 = vld [vmem:[#allocation2 + $0x70] sm:$0xff]  ;;  %v676_v27 = vld [vmem:[#allocation2 + $0x20] sm:$0xff] }
 0x1c9   : > { %v684_v28 = vld [vmem:[#allocation2 + $0x60] sm:$0xff]  ;;  %v679_v31 = vld [vmem:[#allocation2 + $0x38] sm:$0xff]  ;;  %v677_v37 = vld [vmem:[#allocation2 + $0x28] sm:$0xff] }
 0x1ca   : > { %1665 = vmatpush3.bf16.msra.mxu0 %v1864_v51  ;;  %1718 = vmatpush3.bf16.msra.mxu1 %v1864_v51  ;;  %v687_v32 = vld [vmem:[#allocation2 + $0x78] sm:$0xff]  ;;  %v685_v38 = vld [vmem:[#allocation2 + $0x68] sm:$0xff] }
 0x1cb   : > { %1666 = vmatprep.subr.bf16.mxu0 %v1865_v52  ;;  %1711 = vmatprep.subr.bf16.mxu1 %v1865_v52 }
 0x1ce   : > { %1667 = vmatpush3.bf16.msra.mxu0 %v1865_v52  ;;  %1719 = vmatpush3.bf16.msra.mxu1 %v1865_v52 }
 0x1cf   : > { %1668 = vmatprep.subr.bf16.mxu0 %v1866_v55  ;;  %1712 = vmatprep.subr.bf16.mxu1 %v1866_v55 }
 0x1d2   : > { %1669 = vmatpush3.bf16.msra.mxu0 %v1866_v55  ;;  %1720 = vmatpush3.bf16.msra.mxu1 %v1866_v55  ;;  %v2646_v55 = vshrl.u32 (!%p1508_p10), %v1014_v50, 7 }
 0x1d3   : > { %1670 = vmatprep.subr.bf16.mxu0 %v1867_v56  ;;  %1713 = vmatprep.subr.bf16.mxu1 %v1867_v56 }
 0x1d4   : > { %v1025_v50 = vadd.s32 (!%p1508_p10), 80, %v2646_v55 }
 0x1d6   : > { %1671 = vmatpush3.bf16.msra.mxu0 %v1867_v56  ;;  %1721 = vmatpush3.bf16.msra.mxu1 %v1867_v56 }
 0x1d7   : > { %1672 = vmatprep.subr.bf16.mxu0 %v1868_v57  ;;  %1714 = vmatprep.subr.bf16.mxu1 %v1868_v57 }
 0x1da   : > { %1673 = vmatpush3.bf16.msra.mxu0 %v1868_v57  ;;  %1722 = vmatpush3.bf16.msra.mxu1 %v1868_v57 }
 0x1db   : > { %1674 = vmatprep.subr.bf16.mxu0 %v1869_v58  ;;  %1715 = vmatprep.subr.bf16.mxu1 %v1869_v58 }
 0x1de   : > { %1675 = vmatpush3.bf16.msra.mxu0 %v1869_v58  ;;  %1723 = vmatpush3.bf16.msra.mxu1 %v1869_v58 }
 0x1e1   : > { %1677 = vmatmul.mubr.bf16.vlgmr.msra.gmra.mrb[0].mxu0 %v1872_v59  ;;  %1685 = vmatmul.mubr.bf16.vlgmr.msra.gmra.mrb[0].mxu1 %v1873_v60 }
 0x1e2   : > { %1680 = vmatprep.mubr.bf16.mxu0 %v1874_v61  ;;  %1688 = vmatprep.mubr.bf16.mxu1 %v1875_v62 }
 0x1e9   : > { %1681 = vmatmul.mubr.bf16.gmra.mrb[4].mxu0 %v1876_v63  ;;  %1689 = vmatmul.mubr.bf16.gmra.mrb[4].mxu1 %v1877_v0  ;;  %v1017_v63 = vadd.s32 (!%p1508_p10), 16, %v2646_v55 }
 0x2b4   : > { %v1678_v5 = vpop.f32.mrb[0].mxu0  ;;  %v1686_v6 = vpop.f32.mrb[0].mxu1 }
 0x2b5   : > { %v915_v9 = vadd.f32 %v1678_v5, %v674_v1  ;;  %v923_v10 = vadd.f32 %v1686_v6, %v682_v2  ;;  %v850_v11 = vpop.f32.mrb[1].mxu0  ;;  %v882_v12 = vpop.f32.mrb[1].mxu1  ;;  %v1018_v1 = vadd.s32 (!%p1508_p10), 24, %v2646_v55  ;;  %v1016_v2 = vadd.s32 (!%p1508_p10), 8, %v2646_v55 }
 0x2b6   : > { %v913_v15 = vadd.f32 %v850_v11, %v672_v3  ;;  %v921_v16 = vadd.f32 %v882_v12, %v680_v4  ;;  %v1679_v17 = vpop.f32.mrb[2].mxu0  ;;  %v1687_v18 = vpop.f32.mrb[2].mxu1  ;;  %v1020_v5 = vadd.s32 (!%p1508_p10), 40, %v2646_v55  ;;  %v2652_v6 = vstv (!%p1508_p10), %s1048_s6 }
 0x2b7   : > { %931 = vst [vmem:[#allocation2 + $0x10] sm:$0xff] %v915_v9  ;;  %939 = vst [vmem:[#allocation2 + $0x50] sm:$0xff] %v923_v10  ;;  %v916_v19 = vadd.f32 %v1679_v17, %v675_v7  ;;  %v924_v20 = vadd.f32 %v1687_v18, %v683_v8  ;;  %v853_v21 = vpop.f32.mrb[3].mxu0  ;;  %v885_v22 = vpop.f32.mrb[3].mxu1  ;;  %v1019_v8 = vadd.s32 (!%p1508_p10), 32, %v2646_v55  ;;  %vm1052_vm6 = vcmp.lt.s32.totalorder (!%p1508_p10), %v1017_v63, %v2652_v6 }
 0x2b8   : > { %929 = vst [vmem:[#allocation2] sm:$0xff] %v913_v15  ;;  %937 = vst [vmem:[#allocation2 + $0x40] sm:$0xff] %v921_v16  ;;  %v914_v23 = vadd.f32 %v853_v21, %v673_v13  ;;  %v922_v24 = vadd.f32 %v885_v22, %v681_v14  ;;  %vm1050_vm7 = vcmp.lt.s32.totalorder (!%p1508_p10), %v2646_v55, %v2652_v6 }
 0x2b9   : > { %932 = vst [vmem:[#allocation2 + $0x18] sm:$0xff] %v916_v19  ;;  %940 = vst [vmem:[#allocation2 + $0x58] sm:$0xff] %v924_v20  ;;  %vm1053_vm8 = vcmp.lt.s32.totalorder (!%p1508_p10), %v1018_v1, %v2652_v6  ;;  %vm1051_vm9 = vcmp.lt.s32.totalorder (!%p1508_p10), %v1016_v2, %v2652_v6  ;;  %vm1055_vm10 = vcmp.lt.s32.totalorder (!%p1508_p10), %v1020_v5, %v2652_v6  ;;  %v1030_v5 = vadd.s32 (!%p1508_p10), 120, %v2646_v55 }
 0x2ba   : > { %930 = vst [vmem:[#allocation2 + $0x8] sm:$0xff] %v914_v23  ;;  %938 = vst [vmem:[#allocation2 + $0x48] sm:$0xff] %v922_v24  ;;  %vm1054_vm11 = vcmp.lt.s32.totalorder (!%p1508_p10), %v1019_v8, %v2652_v6 }
 0x2bc   : > { %v1682_v29 = vpop.f32.mrb[4].mxu0  ;;  %v1690_v30 = vpop.f32.mrb[4].mxu1  ;;  %948 = sbr.rel (%p1508_p10) target bundleno = 901 (0x385), region = 64 }
 0x2bd   : > { %v919_v33 = vadd.f32 %v1682_v29, %v678_v25  ;;  %v927_v34 = vadd.f32 %v1690_v30, %v686_v26  ;;  %v866_v35 = vpop.f32.mrb[5].mxu0  ;;  %v898_v36 = vpop.f32.mrb[5].mxu1 }
 0x2be   : > { %v917_v39 = vadd.f32 %v866_v35, %v676_v27  ;;  %v925_v40 = vadd.f32 %v898_v36, %v684_v28  ;;  %v1683_v41 = vpop.f32.mrb[6].mxu0  ;;  %v1691_v42 = vpop.f32.mrb[6].mxu1  ;;  %v951_v49 = vld [vmem:[#allocation2 + $0x10] sm:$0xff] (!%p1508_p10)  ;;  %v1022_v28 = vadd.s32 (!%p1508_p10), 56, %v2646_v55 }
 0x2bf   : > { %935 = vst [vmem:[#allocation2 + $0x30] sm:$0xff] %v919_v33  ;;  %943 = vst [vmem:[#allocation2 + $0x70] sm:$0xff] %v927_v34  ;;  %v920_v43 = vadd.f32 %v1683_v41, %v679_v31  ;;  %v928_v44 = vadd.f32 %v1691_v42, %v687_v32  ;;  %v869_v45 = vpop.f32.mrb[7].mxu0  ;;  %v901_v46 = vpop.f32.mrb[7].mxu1  ;;  %v949_v51 = vld [vmem:[#allocation2] sm:$0xff] (!%p1508_p10)  ;;  %vm967_vm0 = vcmp.gt.f32.partialorder (!%p1508_p10), %v951_v49, 0.0 }
 0x2c0   : > { %933 = vst [vmem:[#allocation2 + $0x20] sm:$0xff] %v917_v39  ;;  %941 = vst [vmem:[#allocation2 + $0x60] sm:$0xff] %v925_v40  ;;  %v918_v47 = vadd.f32 %v869_v45, %v677_v37  ;;  %v926_v48 = vadd.f32 %v901_v46, %v685_v38  ;;  %v952_v52 = vld [vmem:[#allocation2 + $0x18] sm:$0xff] (!%p1508_p10)  ;;  %v983_v53 = vmul.f32 (!%p1508_p10), 0.01, %v951_v49  ;;  %vm965_vm1 = vcmp.gt.f32.partialorder (!%p1508_p10), %v949_v51, 0.0 }
 0x2c1   : > { %936 = vst [vmem:[#allocation2 + $0x38] sm:$0xff] %v920_v43  ;;  %944 = vst [vmem:[#allocation2 + $0x78] sm:$0xff] %v928_v44  ;;  %v981_v54 = vmul.f32 (!%p1508_p10), 0.01, %v949_v51  ;;  %vm968_vm2 = vcmp.gt.f32.partialorder (!%p1508_p10), %v952_v52, 0.0  ;;  %v950_v57 = vld [vmem:[#allocation2 + $0x8] sm:$0xff] (!%p1508_p10)  ;;  %vm1057_vm15 = vcmp.lt.s32.totalorder (!%p1508_p10), %v1022_v28, %v2652_v6 }
 0x2c2   : > { %934 = vst [vmem:[#allocation2 + $0x28] sm:$0xff] %v918_v47  ;;  %942 = vst [vmem:[#allocation2 + $0x68] sm:$0xff] %v926_v48  ;;  %v984_v56 = vmul.f32 (!%p1508_p10), 0.01, %v952_v52  ;;  %v999_v59 = vsel (!%p1508_p10), %vm967_vm0, %v951_v49, %v983_v53  ;;  %vm966_vm3 = vcmp.gt.f32.partialorder (!%p1508_p10), %v950_v57, 0.0  ;;  %v958_v21 = vld [vmem:[#allocation2 + $0x48] sm:$0xff] (!%p1508_p10) }
 0x2c3   : > { %v997_v60 = vsel %vm965_vm1, %v949_v51, %v981_v54  ;;  %v982_v61 = vmul.f32 0.01, %v950_v57  ;;  %v2660_v9 = vsel %vm1052_vm6, %v999_v59, 0.0  ;;  %v957_v25 = vld [vmem:[#allocation2 + $0x40] sm:$0xff]  ;;  %v1021_v31 = vadd.s32 48, %v2646_v55  ;;  %v960_v37 = vld [vmem:[#allocation2 + $0x58] sm:$0xff] }
 0x2c4   : > { %v1000_v0 = vsel %vm968_vm2, %v952_v52, %v984_v56  ;;  %v2662_v10 = vsel %vm1050_vm7, %v997_v60, 0.0  ;;  %v1084_v14 = vmul.f32 %v2660_v9, %v2660_v9  ;;  %vm974_vm14 = vcmp.gt.f32.partialorder %v958_v21, 0.0  ;;  %v959_v40 = vld [vmem:[#allocation2 + $0x50] sm:$0xff] }
 0x2c5   : > { %v998_v3 = vsel %vm966_vm3, %v950_v57, %v982_v61  ;;  %v2664_v11 = vsel %vm1053_vm8, %v1000_v0, 0.0  ;;  %v1082_v15 = vmul.f32 %v2662_v10, %v2662_v10  ;;  %v990_v32 = vmul.f32 0.01, %v958_v21 }
 0x2c6   : > { %v2666_v12 = vsel %vm1051_vm9, %v998_v3, 0.0  ;;  %v1085_v16 = vmul.f32 %v2664_v11, %v2664_v11  ;;  %v955_v18 = vld [vmem:[#allocation2 + $0x30] sm:$0xff]  ;;  %1102 = vadd.xlane.f32.xlu1 %v1084_v14  ;;  %v1024_v33 = vadd.s32 72, %v2646_v55  ;;  %vm973_vm0 = vcmp.gt.f32.partialorder %v957_v25, 0.0 }
 0x2c7   : > { %v953_v62 = vld [vmem:[#allocation2 + $0x20] sm:$0xff]  ;;  %v1083_v17 = vmul.f32 %v2666_v12, %v2666_v12  ;;  %1098 = vadd.xlane.f32.xlu0 %v1082_v15  ;;  %vm971_vm13 = vcmp.gt.f32.partialorder %v955_v18, 0.0  ;;  %v987_v30 = vmul.f32 0.01, %v955_v18  ;;  %vm1056_vm1 = vcmp.lt.s32.totalorder %v1021_v31, %v2652_v6  ;;  %v963_v63 = vld [vmem:[#allocation2 + $0x70] sm:$0xff] }
 0x2c8   : > { %vm969_vm5 = vcmp.gt.f32.partialorder %v953_v62, 0.0  ;;  %v985_v7 = vmul.f32 0.01, %v953_v62  ;;  %v956_v13 = vld [vmem:[#allocation2 + $0x38] sm:$0xff]  ;;  %v989_v36 = vmul.f32 0.01, %v957_v25  ;;  %v1006_v39 = vsel %vm974_vm14, %v958_v21, %v990_v32 }
 0x2c9   : > { %v954_v58 = vld [vmem:[#allocation2 + $0x28] sm:$0xff]  ;;  %vm972_vm12 = vcmp.gt.f32.partialorder %v956_v13, 0.0  ;;  %v988_v24 = vmul.f32 0.01, %v956_v13  ;;  %v1003_v35 = vsel %vm971_vm13, %v955_v18, %v987_v30  ;;  %vm1059_vm2 = vcmp.lt.s32.totalorder %v1024_v33, %v2652_v6  ;;  %v961_v53 = vld [vmem:[#allocation2 + $0x60] sm:$0xff]  ;;  %v964_v59 = vld [vmem:[#allocation2 + $0x78] sm:$0xff] }
 0x2ca   : > { %vm970_vm4 = vcmp.gt.f32.partialorder %v954_v58, 0.0  ;;  %v986_v4 = vmul.f32 0.01, %v954_v58  ;;  %v1001_v20 = vsel %vm969_vm5, %v953_v62, %v985_v7  ;;  %1104 = vadd.xlane.f32.xlu1 %v1085_v16  ;;  %v2695_v38 = vsel %vm1056_vm1, %v1003_v35, 0.0  ;;  %v962_v48 = vld [vmem:[#allocation2 + $0x68] sm:$0xff] }
 0x2cb   : > { %v2682_v23 = vsel %vm1054_vm11, %v1001_v20, 0.0  ;;  %v1004_v29 = vsel %vm972_vm12, %v956_v13, %v988_v24  ;;  %1100 = vadd.xlane.f32.xlu0 %v1083_v17  ;;  %v1088_v42 = vmul.f32 %v2695_v38, %v2695_v38  ;;  %v1005_v43 = vsel %vm973_vm0, %v957_v25, %v989_v36 }
 0x2cc   : > { %v1002_v19 = vsel %vm970_vm4, %v954_v58, %v986_v4  ;;  %v1086_v27 = vmul.f32 %v2682_v23, %v2682_v23  ;;  %v2692_v34 = vsel %vm1057_vm15, %v1004_v29, 0.0  ;;  %v1023_v44 = vadd.s32 64, %v2646_v55 }
 0x2cd   : > { %v2680_v22 = vsel %vm1055_vm10, %v1002_v19, 0.0  ;;  %v1089_v41 = vmul.f32 %v2692_v34, %v2692_v34  ;;  %v2703_v45 = vsel %vm1059_vm2, %v1006_v39, 0.0  ;;  %vm976_vm3 = vcmp.gt.f32.partialorder %v960_v37, 0.0 }
 0x2ce   : > { %v1087_v26 = vmul.f32 %v2680_v22, %v2680_v22  ;;  %v992_v46 = vmul.f32 0.01, %v960_v37  ;;  %v1026_v47 = vadd.s32 88, %v2646_v55  ;;  %vm1058_vm4 = vcmp.lt.s32.totalorder %v1023_v44, %v2652_v6 }
 0x2cf   : > { %1106 = vadd.xlane.f32.xlu0 %v1086_v27  ;;  %vm975_vm5 = vcmp.gt.f32.partialorder %v959_v40, 0.0  ;;  %v991_v49 = vmul.f32 0.01, %v959_v40  ;;  %v2708_v51 = vsel %vm1058_vm4, %v1005_v43, 0.0  ;;  %vm1060_vm7 = vcmp.lt.s32.totalorder %v1025_v50, %v2652_v6 }
 0x2d0   : > { %1108 = vadd.xlane.f32.xlu1 %v1087_v26  ;;  %v1008_v52 = vsel %vm976_vm3, %v960_v37, %v992_v46  ;;  %vm1061_vm6 = vcmp.lt.s32.totalorder %v1026_v47, %v2652_v6  ;;  %vm978_vm8 = vcmp.gt.f32.partialorder %v962_v48, 0.0  ;;  %v1091_v56 = vmul.f32 %v2703_v45, %v2703_v45 }
 0x2d1   : > { %v1007_v54 = vsel %vm975_vm5, %v959_v40, %v991_v49  ;;  %v994_v57 = vmul.f32 0.01, %v962_v48  ;;  %v1028_v58 = vadd.s32 104, %v2646_v55  ;;  %v1090_v60 = vmul.f32 %v2708_v51, %v2708_v51 }
 0x2d2   : > { %vm977_vm9 = vcmp.gt.f32.partialorder %v961_v53, 0.0  ;;  %v993_v61 = vmul.f32 0.01, %v961_v53  ;;  %v1027_v62 = vadd.s32 96, %v2646_v55  ;;  %v2718_v0 = vsel %vm1061_vm6, %v1008_v52, 0.0 }
 0x2d3   : > { %1110 = vadd.xlane.f32.xlu0 %v1088_v42  ;;  %v2720_v1 = vsel %vm1060_vm7, %v1007_v54, 0.0  ;;  %v1010_v2 = vsel %vm978_vm8, %v962_v48, %v994_v57  ;;  %vm1063_vm10 = vcmp.lt.s32.totalorder %v1028_v58, %v2652_v6  ;;  %v996_v4 = vmul.f32 0.01, %v964_v59 }
 0x2d4   : > { %1112 = vadd.xlane.f32.xlu1 %v1089_v41  ;;  %v1009_v3 = vsel %vm977_vm9, %v961_v53, %v993_v61  ;;  %vm1062_vm11 = vcmp.lt.s32.totalorder %v1027_v62, %v2652_v6  ;;  %vm980_vm12 = vcmp.gt.f32.partialorder %v964_v59, 0.0  ;;  %vm979_vm13 = vcmp.gt.f32.partialorder %v963_v63, 0.0 }
 0x2d5   : > { %v1093_v7 = vmul.f32 %v2718_v0, %v2718_v0  ;;  %v1092_v8 = vmul.f32 %v2720_v1, %v2720_v1  ;;  %v995_v13 = vmul.f32 0.01, %v963_v63  ;;  %v1029_v14 = vadd.s32 112, %v2646_v55 }
 0x2d6   : > { %v2730_v15 = vsel %vm1063_vm10, %v1010_v2, 0.0  ;;  %v2732_v16 = vsel %vm1062_vm11, %v1009_v3, 0.0  ;;  %v1012_v17 = vsel %vm980_vm12, %v964_v59, %v996_v4  ;;  %vm1065_vm14 = vcmp.lt.s32.totalorder %v1030_v5, %v2652_v6 }
 0x2d7   : > { %1114 = vadd.xlane.f32.xlu0 %v1090_v60  ;;  %v1011_v18 = vsel %vm979_vm13, %v963_v63, %v995_v13  ;;  %vm1064_vm15 = vcmp.lt.s32.totalorder %v1029_v14, %v2652_v6  ;;  %v1095_v19 = vmul.f32 %v2730_v15, %v2730_v15  ;;  %v1094_v20 = vmul.f32 %v2732_v16, %v2732_v16 }
 0x2d8   : > { %1116 = vadd.xlane.f32.xlu1 %v1091_v56  ;;  %v2740_v21 = vsel %vm1065_vm14, %v1012_v17, 0.0  ;;  %v2742_v55 = vsel %vm1064_vm15, %v1011_v18, 0.0 }
 0x2d9   : > { %v1097_v24 = vmul.f32 %v2740_v21, %v2740_v21  ;;  %v1096_v6 = vmul.f32 %v2742_v55, %v2742_v55 }
 0x2db   : > { %1118 = vadd.xlane.f32.xlu0 %v1092_v8 }
 0x2dc   : > { %1120 = vadd.xlane.f32.xlu1 %v1093_v7 }
 0x2df   : > { %1122 = vadd.xlane.f32.xlu0 %v1094_v20 }
 0x2e0   : > { %1124 = vadd.xlane.f32.xlu1 %v1095_v19 }
 0x2e3   : > { %1126 = vadd.xlane.f32.xlu0 %v1096_v6 }
 0x2e4   : > { %1128 = vadd.xlane.f32.xlu1 %v1097_v24 }
 0x353   : > { %v1103_v25 = vpop.xlane.xlu1 %1102 }
 0x354   : > { %v1099_v26 = vpop.xlane.xlu0 %1098  ;;  %v1132_v27 = vmax.f32 %v1103_v25, 1e-24 }
 0x355   : > { %v1130_v28 = vmax.f32 %v1099_v26, 1e-24 }
 0x356   : > { %1878 = vrsqrt.f32 %v1132_v27 }
 0x357   : > { %v1105_v29 = vpop.xlane.xlu1 %1104  ;;  %1880 = vrsqrt.f32 %v1130_v28 }
 0x358   : > { %v1101_v30 = vpop.xlane.xlu0 %1100  ;;  %v1133_v31 = vmax.f32 %v1105_v29, 1e-24 }
 0x359   : > { %v1131_v32 = vmax.f32 %v1101_v30, 1e-24 }
 0x35a   : > { %1882 = vrsqrt.f32 %v1133_v31 }
 0x35b   : > { %1884 = vrsqrt.f32 %v1131_v32 }
 0x35c   : > { %v1107_v35 = vpop.xlane.xlu0 %1106 }
 0x35d   : > { %v1109_v33 = vpop.xlane.xlu1 %1108  ;;  %v1134_v37 = vmax.f32 %v1107_v35, 1e-24 }
 0x35e   : > { %v1135_v36 = vmax.f32 %v1109_v33, 1e-24 }
 0x360   : > { %1886 = vrsqrt.f32 %v1135_v36  ;;  %v1111_v40 = vpop.xlane.xlu0 %1110  ;;  %v1879_v43 = vpop.eup %1878 }
 0x361   : > { %1888 = vrsqrt.f32 %v1134_v37  ;;  %v1113_v39 = vpop.xlane.xlu1 %1112  ;;  %v1136_v42 = vmax.f32 %v1111_v40, 1e-24  ;;  %v1881_v44 = vpop.eup %1880  ;;  %v1164_v53 = vmul.f32 %v1879_v43, %v2660_v9 }
 0x362   : > { %v1137_v41 = vmax.f32 %v1113_v39, 1e-24  ;;  %v1162_v56 = vmul.f32 %v1881_v44, %v2662_v10 }
 0x364   : > { %1890 = vrsqrt.f32 %v1137_v41  ;;  %v1115_v47 = vpop.xlane.xlu0 %1114  ;;  %v1883_v48 = vpop.eup %1882 }
 0x365   : > { %1892 = vrsqrt.f32 %v1136_v42  ;;  %v1117_v46 = vpop.xlane.xlu1 %1116  ;;  %v1138_v50 = vmax.f32 %v1115_v47, 1e-24  ;;  %v1885_v52 = vpop.eup %1884  ;;  %v1165_v54 = vmul.f32 %v1883_v48, %v2664_v11 }
 0x366   : > { %v1139_v49 = vmax.f32 %v1117_v46, 1e-24  ;;  %v1163_v57 = vmul.f32 %v1885_v52, %v2666_v12 }
 0x367   : > { %v1557_v58 = vpack.c.bf16 %v1165_v54, %v1164_v53 }
 0x368   : > { %1894 = vrsqrt.f32 %v1139_v49  ;;  %v1119_v60 = vpop.xlane.xlu0 %1118  ;;  %v1552_v62 = vpack.c.bf16 %v1163_v57, %v1162_v56 }
 0x369   : > { %1896 = vrsqrt.f32 %v1138_v50  ;;  %v1121_v59 = vpop.xlane.xlu1 %1120  ;;  %v1140_v2 = vmax.f32 %v1119_v60, 1e-24  ;;  %1589 = vst [vmem:[%s2604_s19 + $0x8] sm:$0xff] %v1557_v58  }
 0x36a   : > { %v1887_v61 = vpop.eup %1886  ;;  %v1141_v63 = vmax.f32 %v1121_v59, 1e-24  ;;  %1553 = vst [vmem:[%s2604_s19] sm:$0xff] %v1552_v62  }
 0x36b   : > { %v1889_v3 = vpop.eup %1888  ;;  %v1167_v9 = vmul.f32 %v1887_v61, %v2680_v22 }
 0x36c   : > { %v1166_v11 = vmul.f32 %v1889_v3, %v2682_v23  ;;  %1898 = vrsqrt.f32 %v1141_v63  ;;  %v1123_v12 = vpop.xlane.xlu0 %1122 }
 0x36d   : > { %1900 = vrsqrt.f32 %v1140_v2  ;;  %v1125_v10 = vpop.xlane.xlu1 %1124  ;;  %v1142_v8 = vmax.f32 %v1123_v12, 1e-24 }
 0x36e   : > { %v1891_v4 = vpop.eup %1890  ;;  %v1562_v5 = vpack.c.bf16 %v1167_v9, %v1166_v11  ;;  %v1143_v7 = vmax.f32 %v1125_v10, 1e-24 }
 0x36f   : > { %v1893_v13 = vpop.eup %1892  ;;  %v1169_v14 = vmul.f32 %v1891_v4, %v2692_v34 }
 0x370   : > { %1590 = vst [vmem:[%s2604_s19 + $0x10] sm:$0xff] %v1562_v5   ;;  %v1168_v17 = vmul.f32 %v1893_v13, %v2695_v38  ;;  %1902 = vrsqrt.f32 %v1143_v7  ;;  %v1127_v23 = vpop.xlane.xlu0 %1126 }
 0x371   : > { %1904 = vrsqrt.f32 %v1142_v8  ;;  %v1129_v22 = vpop.xlane.xlu1 %1128  ;;  %v1144_v24 = vmax.f32 %v1127_v23, 1e-24 }
 0x372   : > { %v1895_v18 = vpop.eup %1894  ;;  %v1567_v19 = vpack.c.bf16 %v1169_v14, %v1168_v17  ;;  %v1145_v20 = vmax.f32 %v1129_v22, 1e-24 }
 0x373   : > { %v1897_v6 = vpop.eup %1896  ;;  %v1171_v25 = vmul.f32 %v1895_v18, %v2703_v45 }
 0x374   : > { %1591 = vst [vmem:[%s2604_s19 + $0x18] sm:$0xff] %v1567_v19   ;;  %v1170_v26 = vmul.f32 %v1897_v6, %v2708_v51  ;;  %1906 = vrsqrt.f32 %v1145_v20 }
 0x375   : > { %1908 = vrsqrt.f32 %v1144_v24 }
 0x376   : > { %v1899_v34 = vpop.eup %1898  ;;  %v1572_v38 = vpack.c.bf16 %v1171_v25, %v1170_v26 }
 0x377   : > { %v1901_v27 = vpop.eup %1900  ;;  %v1173_v28 = vmul.f32 %v1899_v34, %v2718_v0 }
 0x378   : > { %1592 = vst [vmem:[%s2604_s19 + $0x20] sm:$0xff] %v1572_v38   ;;  %v1172_v29 = vmul.f32 %v1901_v27, %v2720_v1 }
 0x37a   : > { %v1903_v30 = vpop.eup %1902  ;;  %v1577_v31 = vpack.c.bf16 %v1173_v28, %v1172_v29 }
 0x37b   : > { %v1905_v32 = vpop.eup %1904  ;;  %v1175_v45 = vmul.f32 %v1903_v30, %v2730_v15 }
 0x37c   : > { %1593 = vst [vmem:[%s2604_s19 + $0x28] sm:$0xff] %v1577_v31   ;;  %v1174_v51 = vmul.f32 %v1905_v32, %v2732_v16 }
 0x37e   : > { %v1907_v33 = vpop.eup %1906  ;;  %v1582_v35 = vpack.c.bf16 %v1175_v45, %v1174_v51 }
 0x37f   : > { %v1909_v36 = vpop.eup %1908  ;;  %v1177_v37 = vmul.f32 %v1907_v33, %v2740_v21 }
 0x380   : > { %1594 = vst [vmem:[%s2604_s19 + $0x30] sm:$0xff] %v1582_v35   ;;  %v1176_v0 = vmul.f32 %v1909_v36, %v2742_v55 }
 0x382   : > { %v1587_v39 = vpack.c.bf16 %v1177_v37, %v1176_v0 }
 0x384   : > { %1595 = vst [vmem:[%s2604_s19 + $0x38] sm:$0xff] %v1587_v39  }
 0x385 PF: > { %s1548_s12 = sshll.u32 %s2164_s13, 10  ;;  %s2905_s28 = sld [smem:[#allocation30_spill]] }
 0x386   : > { %s1274_s11 = sshll.u32 %s2604_s19, 4  ;;  %s1259_s2 = scalar_lea.sflag [#allocation7], %s2580_s30  ;;  %s2779_s11 = int_to_ptr.vmem [resolvable:$true] %s1274_s11 }
 0x387   : > { %s2040_s3 = scalar_lea.vmem %s2779_s11, 1024  ;;  %p2906_p8 = scmp.ne.s32.totalorder %s2895_s18, 0 }
 0x388   : > { %p2041_p13 = scmp.ne.s32.totalorder %s2779_s11, %s2040_s3  ;;  %s2185_s29 = smov [#allocation13]  }
 0x389   : > { %s2044_s21 = sshll.u32 %s2185_s29, 4  ;;  %s2045_s21 = int_to_ptr.vmem [resolvable:$false] %s2044_s21 }
 0x38a   : > { %p2042_p5 = pnand %p2041_p13, %p2906_p8  ;;  %s2046_s13 = scalar_lea.vmem %s2045_s21, 2048 }
 0x38b   : > { %s2776_s10 = scalar_lea.hbm %s2905_s28, %s1548_s12  ;;  %p2047_p6 = scmp.lt.s32.totalorder %s2779_s11, %s2045_s21 }
 0x38c   : > { %p2043_p9 = pneg %p2042_p5  ;;  %p2048_p0 = scmp.lt.s32.totalorder %s2046_s13, %s2040_s3 }
 0x38e   : > { %p2049_p11 = por %p2048_p0, %p2047_p6 }
 0x390   : > { %p2050_p1 = pnand %p2049_p11, %p2043_p9 }
 0x392   : > { %2053 = shalt.err (!%p2050_p1)
}
 0x393   : > { %s2054_s17 = scalar_lea.hbm %s2776_s10, 1024  ;;  %s2058_s25 = scalar_lea.hbm %s2905_s28, 2048 }
 0x394   : > { %p2055_p4 = scmp.ne.s32.totalorder %s2776_s10, %s2054_s17  ;;  %p2059_p7 = scmp.lt.u32.totalorder %s2776_s10, %s2905_s28 }
 0x395   : > { %p2060_p2 = scmp.lt.u32.totalorder %s2058_s25, %s2054_s17  ;;  %p2062_p13 = scmp.lt.u32.totalorder %s2054_s17, %s2776_s10 }
 0x396   : > { %p2056_p3 = pnand %p2055_p4, %p2906_p8 }
 0x397   : > { %p2061_p10 = por %p2060_p2, %p2059_p7 }
 0x398   : > { %p2057_p12 = pneg %p2056_p3 }
 0x399   : > { %p2063_p5 = por %p2062_p13, %p2061_p10 }
 0x39b   : > { %p2064_p9 = pnand %p2063_p5, %p2057_p12 }
 0x39d   : > { %2067 = shalt.err (!%p2064_p9)
}
 0x39e   : > { %s2186_s19 = smov 64   ;;  %s2187_s27 = smov 4  }
 0x39f   : > { %1732 = dma.vmem_to_hbm [thread:$0]  (%p2906_p8), %s2779_s11, 1024, %s2776_s10, %s1259_s2, %s2186_s19, %s2186_s19, %s2187_s27  }
 0x3a0 PF: > { %s2907_s14 = sld [smem:[#allocation26_spill]]  ;;  %p1752_p6 = scmp.ge.s32.totalorder %s2176_s16, 2 }
 0x3a1   : > { %s1289_s6 = sand.u32 1, %s2136_s7  }
 0x3a2   : > { %s1290_s12 = scalar_lea.sflag [#allocation7], %s1289_s6 }
 0x3a6   : > { %p2908_p0 = scmp.ne.s32.totalorder %s2907_s14, 0 }
 0x3a8   : > { %p1748_p11 = pnand %p1752_p6, %p2908_p0 }
 0x3aa   : > { %2131 = dma.done.wait (!%p1748_p11), %s1290_s12, 1024  }
 0x3ab   : > { %2133 = vsyncadd (!%p1748_p11), %s1290_s12, 4294966272  ;;  %s32_s16 = sadd.s32 1, %s2176_s16   ;;  %s2909_s24 = sld [smem:[#allocation25_spill]] }
 0x3ac   : > { %p29_p1 = scmp.ge.s32.totalorder %s32_s16, 6   ;;  %s2910_s18 = sld [smem:[#allocation20_spill]] }
 0x3ad   : > { %s2911_s11 = sld [smem:[#allocation24_spill]]  ;;  %s2912_s12 = sld [smem:[#allocation21_spill]] }
 0x3ae   : > { %s2913_s14 = sld [smem:[#allocation22_spill]]  ;;  %s2914_s30 = sld [smem:[#allocation23_spill]] }
 0x3af   : > { %s2915_s7 = smov %s2140_s8  ;;  %s2916_s8 = smov %s2144_s9 }
 0x3b0   : > { %s2918_s10 = smov %s2152_s0  ;;  %s2920_s13 = smov %s2172_s15 }
 0x3b1   : > { %s2917_s9 = smov %s2909_s24  ;;  %31 = sbr.rel (!%p29_p1) target bundleno = 26 (0x1a), region = 133 }
 0x3b2   : > { %s2919_s0 = smov %s2910_s18 }
 0x3b4   : > { %s2921_s15 = smov %s2914_s30 }
 0x3b8   :  { %1295 = vsyncpa [#allocation6], 1 }
 0x3b9   :  { %1297 = vsyncpa [#allocation6 + $0x1], 1 }
 0x3ba   :  { %1298 = vsyncpa [#allocation9], 1 }
 0x3bb   :  { %1300 = vsyncpa [#allocation9 + $0x1], 1 }
 0x3bc   :  { %1301 = vsyncpa [#allocation12], 1 }
 0x3bd   :  { %1303 = vsyncpa [#allocation12 + $0x1], 1 }
 0x3be   :  { %1304 = vsyncpa [#allocation7], 1 }
 0x3bf   :  { %1306 = vsyncpa [#allocation7 + $0x1], 1 }

</bundles_post_ra>
